<compile_context>
chip_gen: v5e
topology: v5e:2x2
jax: 0.10.0
libtpu: 0.0.40
codegen_flags: <defaults>
</compile_context>

<pallas_src>
import math
from functools import partial

import jax
import jax.numpy as jnp
from jax.experimental import pallas as pl
from jax.experimental.pallas import tpu as pltpu

BERT_DIM_EMB = 768
TIME_CLIMATE_DIM = 21

_WEIGHT_NAMES = ("W1", "W239", "Bgen", "Wo", "bo")


# ---------------------------------------------------------------------------
# Kernel: one AttentionBlock (pure self-attention) per grid step.
# ---------------------------------------------------------------------------
def fused_attention_kernel(x_ref, w1_ref, w239_ref, bgen_ref, wo_ref, bo_ref,
                           o_ref, *, num_heads, batch):
    """Shapes (per grid step g over {ACT, KLIM}):

    x_ref:    (1, M, D)   bf16  flattened (batch*seq) input rows
    w1_ref:   (1, D, L)   bf16  fused generator layer-1  [key|val|query]
    w239_ref: (1, 3L, L)  f32   row-stacked [W2 ; W3 ; Wkvq(block-diag, q-scaled)]
    bgen_ref: (1, 4, L)   f32   row-stacked [b1 ; b2 ; b3 ; bkvq]
    wo_ref:   (1, H, Hp)  f32   out-projection, lanes zero-padded to Hp
    bo_ref:   (1, 1, Hp)  f32
    o_ref:    (1, M, Hp)  f32   lane-dense output
    """
    M = x_ref.shape[1]
    L = w1_ref.shape[2]
    H, Hp = wo_ref.shape[1], wo_ref.shape[2]
    nh = num_heads
    hd = H // nh
    S = M // batch

    x = x_ref[0]                                                     # (M, D) bf16
    W1 = w1_ref[0]                                                   # (D, L) bf16
    W239 = w239_ref[0]                                               # (3L, L)
    Bg = bgen_ref[0]                                                 # (4, L)
    Wo = wo_ref[0]                                                   # (H, Hp)
    bo = bo_ref[0]                                                   # (1, Hp)

    W2, W3, Wkvq = W239[0:L], W239[L:2 * L], W239[2 * L:3 * L]
    b1, b2, b3, bkvq = Bg[0:1], Bg[1:2], Bg[2:3], Bg[3:4]

    # Fused 3-generator MLP (lanes: [key | value | query], padded to L).
    h1 = jnp.maximum(jnp.dot(x, W1, preferred_element_type=jnp.float32) + b1, 0.0)
    h2 = jnp.maximum(jnp.dot(h1, W2, preferred_element_type=jnp.float32) + b2, 0.0)
    h3 = jnp.dot(h2, W3, preferred_element_type=jnp.float32) + b3    # pre-activation

    kv = jnp.maximum(h3[:, 0:2 * H], 0.0)                            # ReLU key|value
    q_logits = h3[:, 2 * H:3 * H]
    q_e = jnp.exp(q_logits - jnp.max(q_logits, axis=-1, keepdims=True))
    qry = q_e / jnp.sum(q_e, axis=-1, keepdims=True)                 # exact division
    parts = [kv, qry]
    if L > 3 * H:
        parts.append(h3[:, 3 * H:L])                                 # zero pad lanes
    kvq_act = jnp.concatenate(parts, axis=-1)                        # (M, L)

    # Attention in-projection: block-diag [Wk|Wv|Wq*1/sqrt(hd)] -> [k | v | q].
    kvq = jnp.dot(kvq_act, Wkvq, preferred_element_type=jnp.float32) + bkvq
    if L > 3 * H:
        kvq = kvq[:, 0:3 * H]                                        # (M, 3H)

    # Scaled-dot-product attention per batch element (static unroll, B small),
    # heads batched on the leading axis.
    outs = []
    for b in range(batch):
        kb = kvq[b * S:(b + 1) * S]                                  # (S, 3H)
        kh = jnp.concatenate(
            [kb[None, :, h * hd:(h + 1) * hd] for h in range(nh)], axis=0)
        vh = jnp.concatenate(
            [kb[None, :, H + h * hd:H + (h + 1) * hd] for h in range(nh)], axis=0)
        qh = jnp.concatenate(
            [kb[None, :, 2 * H + h * hd:2 * H + (h + 1) * hd] for h in range(nh)],
            axis=0)                                                  # (nh, S, hd)
        s = jax.lax.dot_general(qh, kh, (((2,), (2,)), ((0,), (0,))),
                                preferred_element_type=jnp.float32)  # (nh, S, S)
        p = jnp.exp(s - jnp.max(s, axis=-1, keepdims=True))
        p = p * pl.reciprocal(jnp.sum(p, axis=-1, keepdims=True), approx=True)
        oh = jax.lax.dot_general(p, vh, (((2,), (1,)), ((0,), (0,))),
                                 preferred_element_type=jnp.float32)  # (nh, S, hd)
        outs.append(jnp.concatenate([oh[h] for h in range(nh)], axis=-1))  # (S, H)
    o_all = jnp.concatenate(outs, axis=0)                            # (M, H)

    # Single lane-dense out-projection (Hp = 128-multiple -> unmasked stores).
    out = jnp.dot(o_all, Wo, preferred_element_type=jnp.float32) + bo
    o_ref[0] = out.astype(o_ref.dtype)


# ---------------------------------------------------------------------------
# pallas_call wrapper (one launch for both attention blocks)
# ---------------------------------------------------------------------------
def fused_self_attention_blocks(x_stacked, packed, num_heads, batch):
    """x_stacked: (n_blocks, B*S, D) bf16.  Returns (n_blocks, B*S, Hp) f32."""
    nblk, M, D = x_stacked.shape
    Hp = packed["Wo"].shape[2]
    weights = [packed[n] for n in _WEIGHT_NAMES]

    def wspec(w):
        return pl.BlockSpec((1,) + w.shape[1:],
                            lambda g, _nd=w.ndim: (g,) + (0,) * (_nd - 1))

    kernel = partial(fused_attention_kernel, num_heads=num_heads, batch=batch)
    return pl.pallas_call(
        kernel,
        out_shape=jax.ShapeDtypeStruct((nblk, M, Hp), jnp.float32),
        grid_spec=pltpu.PrefetchScalarGridSpec(
            num_scalar_prefetch=0,
            grid=(nblk,),
            in_specs=[pl.BlockSpec((1, M, D), lambda g: (g, 0, 0))]
                     + [wspec(w) for w in weights],
            out_specs=pl.BlockSpec((1, M, Hp), lambda g: (g, 0, 0)),
        ),
        compiler_params=pltpu.CompilerParams(dimension_semantics=("parallel",)),
    )(x_stacked, *weights)


# ---------------------------------------------------------------------------
# Parameter packing (host/one-time).  Weights are stored pre-transposed (in, out).
# ---------------------------------------------------------------------------
def _round_up(x, m):
    return ((x + m - 1) // m) * m


def _block_diag3(a, b, c):
    r1, c1 = a.shape
    r2, c2 = b.shape
    r3, c3 = c.shape
    out = jnp.zeros((r1 + r2 + r3, c1 + c2 + c3), a.dtype)
    out = out.at[:r1, :c1].set(a)
    out = out.at[r1:r1 + r2, c1:c1 + c2].set(b)
    out = out.at[r1 + r2:, c1 + c2:].set(c)
    return out


def _pack_one_block(p, num_heads, in_dim):
    Din, F = p["kW1"].shape
    H = p["Wo"].shape[0]
    hd = H // num_heads
    L = max(3 * F, 3 * H)
    Hp = _round_up(H, 128)
    scale = 1.0 / math.sqrt(hd)

    def padc(a, cols):
        return jnp.pad(a, ((0, 0), (0, cols - a.shape[1])))

    # generator layer 1 (rows padded to the fused input width, cols to L)
    W1 = padc(jnp.concatenate([p["kW1"], p["vW1"], p["qW1"]], axis=1), L)
    W1 = jnp.pad(W1, ((0, in_dim - Din), (0, 0)))
    b1 = padc(jnp.concatenate([p["kb1"], p["vb1"], p["qb1"]], axis=1), L)
    # generator layer 2 / 3 (block-diagonal, padded to (L, L))
    W2 = _block_diag3(p["kW2"], p["vW2"], p["qW2"])
    W2 = jnp.pad(W2, ((0, L - W2.shape[0]), (0, L - W2.shape[1])))
    b2 = padc(jnp.concatenate([p["kb2"], p["vb2"], p["qb2"]], axis=1), L)
    W3 = _block_diag3(p["kW3"], p["vW3"], p["qW3"])
    W3 = jnp.pad(W3, ((0, L - W3.shape[0]), (0, L - W3.shape[1])))
    b3 = padc(jnp.concatenate([p["kb3"], p["vb3"], p["qb3"]], axis=1), L)
    # attention in-projection, block-diagonal, 1/sqrt(hd) folded into Wq/bq
    Wkvq = _block_diag3(p["Wk"], p["Wv"], p["Wq"] * scale)
    Wkvq = jnp.pad(Wkvq, ((0, L - Wkvq.shape[0]), (0, L - Wkvq.shape[1])))
    bkvq = padc(jnp.concatenate([p["bk"], p["bv"], p["bq"] * scale], axis=1), L)
    # out-projection, zero-padded to a 128-lane multiple
    Wo = jnp.pad(p["Wo"], ((0, 0), (0, Hp - H)))
    bo = jnp.pad(p["bo"], ((0, 0), (0, Hp - H)))

    return {"W1": W1,
            "W239": jnp.concatenate([W2, W3, Wkvq], axis=0),
            "Bgen": jnp.concatenate([b1, b2, b3, bkvq], axis=0),
            "Wo": Wo,
            "bo": bo}


def pack_fused_attention_params(p_act, p_klim, num_heads):
    """Stack the two AttentionBlocks' packed weights along a leading block axis."""
    in_dim = max(p_act["kW1"].shape[0], p_klim["kW1"].shape[0])
    a = _pack_one_block(p_act, num_heads, in_dim)
    k = _pack_one_block(p_klim, num_heads, in_dim)
    packed = {n: jnp.stack([a[n], k[n]], axis=0) for n in _WEIGHT_NAMES}
    # bf16 for the only sizable HBM traffic (x @ W1, K=768); accumulate in f32.
    packed["W1"] = packed["W1"].astype(jnp.bfloat16)
    return packed


# ---------------------------------------------------------------------------
# attentive_optimizer forward (well-defined portion)
# ---------------------------------------------------------------------------
@partial(jax.jit, static_argnames=("num_heads",))
def attentive_optimizer_forward(packed_params, ocu_ber_emb, espai_enc,
                                general_data, h, c, *, num_heads):
    del espai_enc  # only consumed by the undefined part of the reference forward
    B, S, D = ocu_ber_emb.shape
    Dk = general_data.shape[1]
    H = packed_params["Wo"].shape[1]

    # Stack the ACT input and the (zero-padded, row-replicated) KLIM input so
    # both attention blocks run in ONE pallas_call.  The reference repeats
    # general_data 34x -> all rows identical -> attention output rows identical,
    # so S identical rows + a broadcast of row 0 to 34 reproduces it (exact in
    # real arithmetic; within fp tolerance of the 34-row reduction).
    x_act = ocu_ber_emb.reshape(B * S, D)
    gd = jnp.pad(general_data, ((0, 0), (0, D - Dk)))
    x_klim = jnp.broadcast_to(gd[:, None, :], (B, S, D)).reshape(B * S, D)
    x = jnp.stack([x_act, x_klim], axis=0).astype(jnp.bfloat16)      # (2, B*S, D)

    out = fused_self_attention_blocks(x, packed_params, num_heads, B)  # (2, B*S, Hp)
    out = out.reshape(2, B, S, -1)
    ACTrepr = out[0, :, :, :H]
    KLIMrepr = jnp.broadcast_to(out[1, :, 0:1, :H], (B, 34, H))
    # TODO(synk): remainder of the reference forward uses undefined names /
    # attributes (KLIM_repr, self.selfattn1, espai_emb, gatingFC_ocu/esp,
    # self.lstm, self.regressFC, nn.softmax()) and cannot be translated
    # faithfully; we return the two well-defined attention representations
    # plus (h, c).
    return ACTrepr, KLIMrepr, h, c


# ---------------------------------------------------------------------------
# Deterministic parameter construction (xavier_uniform weights, zero biases —
# matching init_weights()).  Weights stored pre-transposed as (in, out).
# ---------------------------------------------------------------------------
def _xavier(key, fan_in, fan_out):
    bound = math.sqrt(6.0 / (fan_in + fan_out))
    return jax.random.uniform(key, (fan_in, fan_out), jnp.float32, -bound, bound)


def make_attention_block_params(key, key_dim, val_dim, query_dim, hidden_dim, attnFCdim):
    ks = jax.random.split(key, 13)
    z = lambda n: jnp.zeros((1, n), jnp.float32)
    p = {}
    p["kW1"], p["kb1"] = _xavier(ks[0], key_dim, attnFCdim), z(attnFCdim)
    p["kW2"], p["kb2"] = _xavier(ks[1], attnFCdim, attnFCdim), z(attnFCdim)
    p["kW3"], p["kb3"] = _xavier(ks[2], attnFCdim, hidden_dim), z(hidden_dim)
    p["vW1"], p["vb1"] = _xavier(ks[3], val_dim, attnFCdim), z(attnFCdim)
    p["vW2"], p["vb2"] = _xavier(ks[4], attnFCdim, attnFCdim), z(attnFCdim)
    p["vW3"], p["vb3"] = _xavier(ks[5], attnFCdim, hidden_dim), z(hidden_dim)
    p["qW1"], p["qb1"] = _xavier(ks[6], query_dim, attnFCdim), z(attnFCdim)
    p["qW2"], p["qb2"] = _xavier(ks[7], attnFCdim, attnFCdim), z(attnFCdim)
    p["qW3"], p["qb3"] = _xavier(ks[8], attnFCdim, hidden_dim), z(hidden_dim)
    p["Wq"], p["bq"] = _xavier(ks[9], hidden_dim, hidden_dim), z(hidden_dim)
    p["Wk"], p["bk"] = _xavier(ks[10], hidden_dim, hidden_dim), z(hidden_dim)
    p["Wv"], p["bv"] = _xavier(ks[11], hidden_dim, hidden_dim), z(hidden_dim)
    p["Wo"], p["bo"] = _xavier(ks[12], hidden_dim, hidden_dim), z(hidden_dim)
    return p


# ---------------------------------------------------------------------------
# Pure-JAX reference (mirrors the PyTorch AttentionBlock) for a sanity check.
# ---------------------------------------------------------------------------
def _ref_attention_block(x, p, num_heads):
    def mlp(inp, W1, b1, W2, b2, W3, b3, last):
        hh = jax.nn.relu(inp @ W1 + b1)
        hh = jax.nn.relu(hh @ W2 + b2)
        hh = hh @ W3 + b3
        return jax.nn.softmax(hh, axis=-1) if last == "softmax" else jax.nn.relu(hh)

    key = mlp(x, p["kW1"], p["kb1"], p["kW2"], p["kb2"], p["kW3"], p["kb3"], "relu")
    val = mlp(x, p["vW1"], p["vb1"], p["vW2"], p["vb2"], p["vW3"], p["vb3"], "relu")
    qry = mlp(x, p["qW1"], p["qb1"], p["qW2"], p["qb2"], p["qW3"], p["qb3"], "softmax")
    q = qry @ p["Wq"] + p["bq"]
    k = key @ p["Wk"] + p["bk"]
    v = val @ p["Wv"] + p["bv"]
    B, S, H = q.shape
    hd = H // num_heads
    qh = q.reshape(B, S, num_heads, hd).transpose(0, 2, 1, 3)
    kh = k.reshape(B, S, num_heads, hd).transpose(0, 2, 1, 3)
    vh = v.reshape(B, S, num_heads, hd).transpose(0, 2, 1, 3)
    s = jnp.einsum("bhqd,bhkd->bhqk", qh, kh) / math.sqrt(hd)
    a = jax.nn.softmax(s, axis=-1)
    o = jnp.einsum("bhqk,bhkd->bhqd", a, vh)
    o = o.transpose(0, 2, 1, 3).reshape(B, S, H)
    return o @ p["Wo"] + p["bo"]


if __name__ == "__main__":
    hidden_dim, lstm_nl, nheads, attnFCdim = 32, 1, 4, 32
    B, S = 2, 8

    root = jax.random.PRNGKey(0)
    k1, k2, k3, k4 = jax.random.split(root, 4)
    ocu_ber_emb = jax.random.normal(k1, (B, S, BERT_DIM_EMB), jnp.float32)
    espai_enc = jax.random.normal(k2, (B, S, hidden_dim), jnp.float32)
    general_data = jax.random.normal(k3, (B, TIME_CLIMATE_DIM), jnp.float32)
    h = jnp.zeros((lstm_nl, B, hidden_dim), jnp.float32)
    c = jnp.zeros((lstm_nl, B, hidden_dim), jnp.float32)

    pk_act, pk_klim = jax.random.split(k4)
    raw_act = make_attention_block_params(
        pk_act, BERT_DIM_EMB, BERT_DIM_EMB, BERT_DIM_EMB, hidden_dim, attnFCdim)
    raw_klim = make_attention_block_params(
        pk_klim, TIME_CLIMATE_DIM, TIME_CLIMATE_DIM, TIME_CLIMATE_DIM,
        hidden_dim, attnFCdim)
    packed_params = pack_fused_attention_params(raw_act, raw_klim, nheads)

    ACTrepr, KLIMrepr, h_out, c_out = attentive_optimizer_forward(
        packed_params, ocu_ber_emb, espai_enc, general_data, h, c,
        num_heads=nheads)
    jax.block_until_ready((ACTrepr, KLIMrepr, h_out, c_out))
    assert ACTrepr.shape == (B, S, hidden_dim)
    assert KLIMrepr.shape == (B, 34, hidden_dim)

    # Sanity check against a pure-JAX reference of the PyTorch forward
    # (kernel uses bf16 for x / W1, hence the loose-ish tolerances).
    act_ref = _ref_attention_block(ocu_ber_emb, raw_act, nheads)
    general_rep = jnp.repeat(general_data[:, None, :], 34, axis=1)
    klim_ref = _ref_attention_block(general_rep, raw_klim, nheads)
    assert jnp.allclose(ACTrepr, act_ref, atol=5e-2, rtol=5e-2)
    assert jnp.allclose(KLIMrepr, klim_ref, atol=5e-2, rtol=5e-2)

    print("KERNEL_OK")
</pallas_src>

<mosaic_0001>
module attributes {stable_mosaic.version = 11 : i64} {
  func.func @fused_attention_kernel(%arg0: i32, %arg1: memref<1x16x768xbf16, #tpu.memory_space<vmem>>, %arg2: memref<1x768x96xbf16, #tpu.memory_space<vmem>>, %arg3: memref<1x288x96xf32, #tpu.memory_space<vmem>>, %arg4: memref<1x4x96xf32, #tpu.memory_space<vmem>>, %arg5: memref<1x32x128xf32, #tpu.memory_space<vmem>>, %arg6: memref<1x1x128xf32, #tpu.memory_space<vmem>>, %arg7: memref<1x16x128xf32, #tpu.memory_space<vmem>>) attributes {dimension_semantics = [#tpu.dimension_semantics<parallel>], iteration_bounds = array<i64: 2>, scalar_prefetch = 0 : i64, scratch_operands = 0 : i64, tpu.core_type = #tpu.core_type<tc>, window_params = [{transform_indices = @transform_0, window_bounds = array<i64: 1, 16, 768>}, {transform_indices = @transform_1, window_bounds = array<i64: 1, 768, 96>}, {transform_indices = @transform_2, window_bounds = array<i64: 1, 288, 96>}, {transform_indices = @transform_3, window_bounds = array<i64: 1, 4, 96>}, {transform_indices = @transform_4, window_bounds = array<i64: 1, 32, 128>}, {transform_indices = @transform_5, window_bounds = array<i64: 1, 1, 128>}, {transform_indices = @transform_6, window_bounds = array<i64: 1, 16, 128>}]} {
    %c0 = arith.constant 0 : index
    %c0_0 = arith.constant 0 : index
    %c0_1 = arith.constant 0 : index
    %0 = vector.load %arg1[%c0, %c0_0, %c0_1] : memref<1x16x768xbf16, #tpu.memory_space<vmem>>, vector<1x16x768xbf16>
    %1 = vector.shape_cast %0 : vector<1x16x768xbf16> to vector<16x768xbf16>
    %c0_2 = arith.constant 0 : index
    %c0_3 = arith.constant 0 : index
    %c0_4 = arith.constant 0 : index
    %2 = vector.load %arg2[%c0_2, %c0_3, %c0_4] : memref<1x768x96xbf16, #tpu.memory_space<vmem>>, vector<1x768x96xbf16>
    %3 = vector.shape_cast %2 : vector<1x768x96xbf16> to vector<768x96xbf16>
    %c0_5 = arith.constant 0 : index
    %c0_6 = arith.constant 0 : index
    %c0_7 = arith.constant 0 : index
    %4 = vector.load %arg3[%c0_5, %c0_6, %c0_7] : memref<1x288x96xf32, #tpu.memory_space<vmem>>, vector<1x288x96xf32>
    %5 = vector.shape_cast %4 : vector<1x288x96xf32> to vector<288x96xf32>
    %c0_8 = arith.constant 0 : index
    %c0_9 = arith.constant 0 : index
    %c0_10 = arith.constant 0 : index
    %6 = vector.load %arg4[%c0_8, %c0_9, %c0_10] : memref<1x4x96xf32, #tpu.memory_space<vmem>>, vector<1x4x96xf32>
    %7 = vector.shape_cast %6 : vector<1x4x96xf32> to vector<4x96xf32>
    %c0_11 = arith.constant 0 : index
    %c0_12 = arith.constant 0 : index
    %c0_13 = arith.constant 0 : index
    %8 = vector.load %arg5[%c0_11, %c0_12, %c0_13] : memref<1x32x128xf32, #tpu.memory_space<vmem>>, vector<1x32x128xf32>
    %9 = vector.shape_cast %8 : vector<1x32x128xf32> to vector<32x128xf32>
    %c0_14 = arith.constant 0 : index
    %c0_15 = arith.constant 0 : index
    %c0_16 = arith.constant 0 : index
    %10 = vector.load %arg6[%c0_14, %c0_15, %c0_16] : memref<1x1x128xf32, #tpu.memory_space<vmem>>, vector<1x1x128xf32>
    %11 = vector.shape_cast %10 : vector<1x1x128xf32> to vector<1x128xf32>
    %12 = vector.extract_strided_slice %5 {offsets = [0, 0], sizes = [96, 96], strides = [1, 1]} : vector<288x96xf32> to vector<96x96xf32>
    %13 = vector.extract_strided_slice %5 {offsets = [96, 0], sizes = [96, 96], strides = [1, 1]} : vector<288x96xf32> to vector<96x96xf32>
    %14 = vector.extract_strided_slice %5 {offsets = [192, 0], sizes = [96, 96], strides = [1, 1]} : vector<288x96xf32> to vector<96x96xf32>
    %15 = vector.extract_strided_slice %7 {offsets = [0, 0], sizes = [1, 96], strides = [1, 1]} : vector<4x96xf32> to vector<1x96xf32>
    %16 = vector.extract_strided_slice %7 {offsets = [1, 0], sizes = [1, 96], strides = [1, 1]} : vector<4x96xf32> to vector<1x96xf32>
    %17 = vector.extract_strided_slice %7 {offsets = [2, 0], sizes = [1, 96], strides = [1, 1]} : vector<4x96xf32> to vector<1x96xf32>
    %18 = vector.extract_strided_slice %7 {offsets = [3, 0], sizes = [1, 96], strides = [1, 1]} : vector<4x96xf32> to vector<1x96xf32>
    %cst = arith.constant dense<0.000000e+00> : vector<16x96xf32>
    %19 = tpu.matmul %1, %3, %cst {dimension_numbers = #tpu.dot_dimension_numbers<[1], [0], [0], [1], [0, 0, 1, 1], [], []>} : vector<16x768xbf16>, vector<768x96xbf16>, vector<16x96xf32> -> vector<16x96xf32>
    %20 = vector.broadcast %15 : vector<1x96xf32> to vector<16x96xf32>
    %21 = arith.addf %19, %20 : vector<16x96xf32>
    %cst_17 = arith.constant 0.000000e+00 : f32
    %22 = vector.broadcast %cst_17 : f32 to vector<16x96xf32>
    %23 = arith.maximumf %21, %22 : vector<16x96xf32>
    %cst_18 = arith.constant dense<0.000000e+00> : vector<16x96xf32>
    %24 = tpu.matmul %23, %12, %cst_18 {dimension_numbers = #tpu.dot_dimension_numbers<[1], [0], [0], [1], [0, 0, 1, 1], [], []>} : vector<16x96xf32>, vector<96x96xf32>, vector<16x96xf32> -> vector<16x96xf32>
    %25 = vector.broadcast %16 : vector<1x96xf32> to vector<16x96xf32>
    %26 = arith.addf %24, %25 : vector<16x96xf32>
    %cst_19 = arith.constant 0.000000e+00 : f32
    %27 = vector.broadcast %cst_19 : f32 to vector<16x96xf32>
    %28 = arith.maximumf %26, %27 : vector<16x96xf32>
    %cst_20 = arith.constant dense<0.000000e+00> : vector<16x96xf32>
    %29 = tpu.matmul %28, %13, %cst_20 {dimension_numbers = #tpu.dot_dimension_numbers<[1], [0], [0], [1], [0, 0, 1, 1], [], []>} : vector<16x96xf32>, vector<96x96xf32>, vector<16x96xf32> -> vector<16x96xf32>
    %30 = vector.broadcast %17 : vector<1x96xf32> to vector<16x96xf32>
    %31 = arith.addf %29, %30 : vector<16x96xf32>
    %32 = vector.extract_strided_slice %31 {offsets = [0, 0], sizes = [16, 64], strides = [1, 1]} : vector<16x96xf32> to vector<16x64xf32>
    %cst_21 = arith.constant 0.000000e+00 : f32
    %33 = vector.broadcast %cst_21 : f32 to vector<16x64xf32>
    %34 = arith.maximumf %32, %33 : vector<16x64xf32>
    %35 = vector.extract_strided_slice %31 {offsets = [0, 64], sizes = [16, 32], strides = [1, 1]} : vector<16x96xf32> to vector<16x32xf32>
    %cst_22 = arith.constant dense<0xFF800000> : vector<16xf32>
    %36 = vector.multi_reduction <maximumf>, %35, %cst_22 [1] : vector<16x32xf32> to vector<16xf32>
    %37 = vector.shape_cast %36 : vector<16xf32> to vector<16x1xf32>
    %38 = vector.broadcast %37 : vector<16x1xf32> to vector<16x32xf32>
    %39 = arith.subf %35, %38 : vector<16x32xf32>
    %40 = math.exp %39 : vector<16x32xf32>
    %cst_23 = arith.constant dense<0.000000e+00> : vector<16xf32>
    %41 = vector.multi_reduction <add>, %40, %cst_23 [1] : vector<16x32xf32> to vector<16xf32>
    %42 = vector.shape_cast %41 : vector<16xf32> to vector<16x1xf32>
    %43 = vector.broadcast %42 : vector<16x1xf32> to vector<16x32xf32>
    %44 = arith.divf %40, %43 : vector<16x32xf32>
    %45 = tpu.concatenate %34, %44 in 1 : vector<16x64xf32>, vector<16x32xf32> -> vector<16x96xf32>
    %cst_24 = arith.constant dense<0.000000e+00> : vector<16x96xf32>
    %46 = tpu.matmul %45, %14, %cst_24 {dimension_numbers = #tpu.dot_dimension_numbers<[1], [0], [0], [1], [0, 0, 1, 1], [], []>} : vector<16x96xf32>, vector<96x96xf32>, vector<16x96xf32> -> vector<16x96xf32>
    %47 = vector.broadcast %18 : vector<1x96xf32> to vector<16x96xf32>
    %48 = arith.addf %46, %47 : vector<16x96xf32>
    %49 = vector.extract_strided_slice %48 {offsets = [0, 0], sizes = [8, 96], strides = [1, 1]} : vector<16x96xf32> to vector<8x96xf32>
    %50 = vector.extract_strided_slice %49 {offsets = [0, 0], sizes = [8, 8], strides = [1, 1]} : vector<8x96xf32> to vector<8x8xf32>
    %51 = vector.shape_cast %50 : vector<8x8xf32> to vector<1x8x8xf32>
    %52 = vector.extract_strided_slice %49 {offsets = [0, 8], sizes = [8, 8], strides = [1, 1]} : vector<8x96xf32> to vector<8x8xf32>
    %53 = vector.shape_cast %52 : vector<8x8xf32> to vector<1x8x8xf32>
    %54 = vector.extract_strided_slice %49 {offsets = [0, 16], sizes = [8, 8], strides = [1, 1]} : vector<8x96xf32> to vector<8x8xf32>
    %55 = vector.shape_cast %54 : vector<8x8xf32> to vector<1x8x8xf32>
    %56 = vector.extract_strided_slice %49 {offsets = [0, 24], sizes = [8, 8], strides = [1, 1]} : vector<8x96xf32> to vector<8x8xf32>
    %57 = vector.shape_cast %56 : vector<8x8xf32> to vector<1x8x8xf32>
    %58 = tpu.concatenate %51, %53, %55, %57 in 0 : vector<1x8x8xf32>, vector<1x8x8xf32>, vector<1x8x8xf32>, vector<1x8x8xf32> -> vector<4x8x8xf32>
    %59 = vector.extract_strided_slice %49 {offsets = [0, 32], sizes = [8, 8], strides = [1, 1]} : vector<8x96xf32> to vector<8x8xf32>
    %60 = vector.shape_cast %59 : vector<8x8xf32> to vector<1x8x8xf32>
    %61 = vector.extract_strided_slice %49 {offsets = [0, 40], sizes = [8, 8], strides = [1, 1]} : vector<8x96xf32> to vector<8x8xf32>
    %62 = vector.shape_cast %61 : vector<8x8xf32> to vector<1x8x8xf32>
    %63 = vector.extract_strided_slice %49 {offsets = [0, 48], sizes = [8, 8], strides = [1, 1]} : vector<8x96xf32> to vector<8x8xf32>
    %64 = vector.shape_cast %63 : vector<8x8xf32> to vector<1x8x8xf32>
    %65 = vector.extract_strided_slice %49 {offsets = [0, 56], sizes = [8, 8], strides = [1, 1]} : vector<8x96xf32> to vector<8x8xf32>
    %66 = vector.shape_cast %65 : vector<8x8xf32> to vector<1x8x8xf32>
    %67 = tpu.concatenate %60, %62, %64, %66 in 0 : vector<1x8x8xf32>, vector<1x8x8xf32>, vector<1x8x8xf32>, vector<1x8x8xf32> -> vector<4x8x8xf32>
    %68 = vector.extract_strided_slice %49 {offsets = [0, 64], sizes = [8, 8], strides = [1, 1]} : vector<8x96xf32> to vector<8x8xf32>
    %69 = vector.shape_cast %68 : vector<8x8xf32> to vector<1x8x8xf32>
    %70 = vector.extract_strided_slice %49 {offsets = [0, 72], sizes = [8, 8], strides = [1, 1]} : vector<8x96xf32> to vector<8x8xf32>
    %71 = vector.shape_cast %70 : vector<8x8xf32> to vector<1x8x8xf32>
    %72 = vector.extract_strided_slice %49 {offsets = [0, 80], sizes = [8, 8], strides = [1, 1]} : vector<8x96xf32> to vector<8x8xf32>
    %73 = vector.shape_cast %72 : vector<8x8xf32> to vector<1x8x8xf32>
    %74 = vector.extract_strided_slice %49 {offsets = [0, 88], sizes = [8, 8], strides = [1, 1]} : vector<8x96xf32> to vector<8x8xf32>
    %75 = vector.shape_cast %74 : vector<8x8xf32> to vector<1x8x8xf32>
    %76 = tpu.concatenate %69, %71, %73, %75 in 0 : vector<1x8x8xf32>, vector<1x8x8xf32>, vector<1x8x8xf32>, vector<1x8x8xf32> -> vector<4x8x8xf32>
    %cst_25 = arith.constant dense<0.000000e+00> : vector<4x8x8xf32>
    %77 = tpu.matmul %76, %58, %cst_25 {dimension_numbers = #tpu.dot_dimension_numbers<[2], [2], [1], [1], [0, 0, 0, 1, 1, 1], [0], [0]>} : vector<4x8x8xf32>, vector<4x8x8xf32>, vector<4x8x8xf32> -> vector<4x8x8xf32>
    %cst_26 = arith.constant dense<0xFF800000> : vector<4x8xf32>
    %78 = vector.multi_reduction <maximumf>, %77, %cst_26 [2] : vector<4x8x8xf32> to vector<4x8xf32>
    %79 = vector.shape_cast %78 : vector<4x8xf32> to vector<4x8x1xf32>
    %80 = vector.broadcast %79 : vector<4x8x1xf32> to vector<4x8x8xf32>
    %81 = arith.subf %77, %80 : vector<4x8x8xf32>
    %82 = math.exp %81 : vector<4x8x8xf32>
    %cst_27 = arith.constant dense<0.000000e+00> : vector<4x8xf32>
    %83 = vector.multi_reduction <add>, %82, %cst_27 [2] : vector<4x8x8xf32> to vector<4x8xf32>
    %84 = vector.shape_cast %83 : vector<4x8xf32> to vector<4x8x1xf32>
    %85 = tpu.reciprocal %84 {approx = true} : vector<4x8x1xf32> -> vector<4x8x1xf32>
    %86 = vector.broadcast %85 : vector<4x8x1xf32> to vector<4x8x8xf32>
    %87 = arith.mulf %82, %86 : vector<4x8x8xf32>
    %cst_28 = arith.constant dense<0.000000e+00> : vector<4x8x8xf32>
    %88 = tpu.matmul %87, %67, %cst_28 {dimension_numbers = #tpu.dot_dimension_numbers<[2], [1], [1], [2], [0, 0, 0, 1, 1, 2], [0], [0]>} : vector<4x8x8xf32>, vector<4x8x8xf32>, vector<4x8x8xf32> -> vector<4x8x8xf32>
    %89 = vector.extract_strided_slice %88 {offsets = [0, 0, 0], sizes = [1, 8, 8], strides = [1, 1, 1]} : vector<4x8x8xf32> to vector<1x8x8xf32>
    %90 = vector.shape_cast %89 : vector<1x8x8xf32> to vector<8x8xf32>
    %91 = vector.extract_strided_slice %88 {offsets = [1, 0, 0], sizes = [1, 8, 8], strides = [1, 1, 1]} : vector<4x8x8xf32> to vector<1x8x8xf32>
    %92 = vector.shape_cast %91 : vector<1x8x8xf32> to vector<8x8xf32>
    %93 = vector.extract_strided_slice %88 {offsets = [2, 0, 0], sizes = [1, 8, 8], strides = [1, 1, 1]} : vector<4x8x8xf32> to vector<1x8x8xf32>
    %94 = vector.shape_cast %93 : vector<1x8x8xf32> to vector<8x8xf32>
    %95 = vector.extract_strided_slice %88 {offsets = [3, 0, 0], sizes = [1, 8, 8], strides = [1, 1, 1]} : vector<4x8x8xf32> to vector<1x8x8xf32>
    %96 = vector.shape_cast %95 : vector<1x8x8xf32> to vector<8x8xf32>
    %97 = tpu.concatenate %90, %92, %94, %96 in 1 : vector<8x8xf32>, vector<8x8xf32>, vector<8x8xf32>, vector<8x8xf32> -> vector<8x32xf32>
    %98 = vector.extract_strided_slice %48 {offsets = [8, 0], sizes = [8, 96], strides = [1, 1]} : vector<16x96xf32> to vector<8x96xf32>
    %99 = vector.extract_strided_slice %98 {offsets = [0, 0], sizes = [8, 8], strides = [1, 1]} : vector<8x96xf32> to vector<8x8xf32>
    %100 = vector.shape_cast %99 : vector<8x8xf32> to vector<1x8x8xf32>
    %101 = vector.extract_strided_slice %98 {offsets = [0, 8], sizes = [8, 8], strides = [1, 1]} : vector<8x96xf32> to vector<8x8xf32>
    %102 = vector.shape_cast %101 : vector<8x8xf32> to vector<1x8x8xf32>
    %103 = vector.extract_strided_slice %98 {offsets = [0, 16], sizes = [8, 8], strides = [1, 1]} : vector<8x96xf32> to vector<8x8xf32>
    %104 = vector.shape_cast %103 : vector<8x8xf32> to vector<1x8x8xf32>
    %105 = vector.extract_strided_slice %98 {offsets = [0, 24], sizes = [8, 8], strides = [1, 1]} : vector<8x96xf32> to vector<8x8xf32>
    %106 = vector.shape_cast %105 : vector<8x8xf32> to vector<1x8x8xf32>
    %107 = tpu.concatenate %100, %102, %104, %106 in 0 : vector<1x8x8xf32>, vector<1x8x8xf32>, vector<1x8x8xf32>, vector<1x8x8xf32> -> vector<4x8x8xf32>
    %108 = vector.extract_strided_slice %98 {offsets = [0, 32], sizes = [8, 8], strides = [1, 1]} : vector<8x96xf32> to vector<8x8xf32>
    %109 = vector.shape_cast %108 : vector<8x8xf32> to vector<1x8x8xf32>
    %110 = vector.extract_strided_slice %98 {offsets = [0, 40], sizes = [8, 8], strides = [1, 1]} : vector<8x96xf32> to vector<8x8xf32>
    %111 = vector.shape_cast %110 : vector<8x8xf32> to vector<1x8x8xf32>
    %112 = vector.extract_strided_slice %98 {offsets = [0, 48], sizes = [8, 8], strides = [1, 1]} : vector<8x96xf32> to vector<8x8xf32>
    %113 = vector.shape_cast %112 : vector<8x8xf32> to vector<1x8x8xf32>
    %114 = vector.extract_strided_slice %98 {offsets = [0, 56], sizes = [8, 8], strides = [1, 1]} : vector<8x96xf32> to vector<8x8xf32>
    %115 = vector.shape_cast %114 : vector<8x8xf32> to vector<1x8x8xf32>
    %116 = tpu.concatenate %109, %111, %113, %115 in 0 : vector<1x8x8xf32>, vector<1x8x8xf32>, vector<1x8x8xf32>, vector<1x8x8xf32> -> vector<4x8x8xf32>
    %117 = vector.extract_strided_slice %98 {offsets = [0, 64], sizes = [8, 8], strides = [1, 1]} : vector<8x96xf32> to vector<8x8xf32>
    %118 = vector.shape_cast %117 : vector<8x8xf32> to vector<1x8x8xf32>
    %119 = vector.extract_strided_slice %98 {offsets = [0, 72], sizes = [8, 8], strides = [1, 1]} : vector<8x96xf32> to vector<8x8xf32>
    %120 = vector.shape_cast %119 : vector<8x8xf32> to vector<1x8x8xf32>
    %121 = vector.extract_strided_slice %98 {offsets = [0, 80], sizes = [8, 8], strides = [1, 1]} : vector<8x96xf32> to vector<8x8xf32>
    %122 = vector.shape_cast %121 : vector<8x8xf32> to vector<1x8x8xf32>
    %123 = vector.extract_strided_slice %98 {offsets = [0, 88], sizes = [8, 8], strides = [1, 1]} : vector<8x96xf32> to vector<8x8xf32>
    %124 = vector.shape_cast %123 : vector<8x8xf32> to vector<1x8x8xf32>
    %125 = tpu.concatenate %118, %120, %122, %124 in 0 : vector<1x8x8xf32>, vector<1x8x8xf32>, vector<1x8x8xf32>, vector<1x8x8xf32> -> vector<4x8x8xf32>
    %cst_29 = arith.constant dense<0.000000e+00> : vector<4x8x8xf32>
    %126 = tpu.matmul %125, %107, %cst_29 {dimension_numbers = #tpu.dot_dimension_numbers<[2], [2], [1], [1], [0, 0, 0, 1, 1, 1], [0], [0]>} : vector<4x8x8xf32>, vector<4x8x8xf32>, vector<4x8x8xf32> -> vector<4x8x8xf32>
    %cst_30 = arith.constant dense<0xFF800000> : vector<4x8xf32>
    %127 = vector.multi_reduction <maximumf>, %126, %cst_30 [2] : vector<4x8x8xf32> to vector<4x8xf32>
    %128 = vector.shape_cast %127 : vector<4x8xf32> to vector<4x8x1xf32>
    %129 = vector.broadcast %128 : vector<4x8x1xf32> to vector<4x8x8xf32>
    %130 = arith.subf %126, %129 : vector<4x8x8xf32>
    %131 = math.exp %130 : vector<4x8x8xf32>
    %cst_31 = arith.constant dense<0.000000e+00> : vector<4x8xf32>
    %132 = vector.multi_reduction <add>, %131, %cst_31 [2] : vector<4x8x8xf32> to vector<4x8xf32>
    %133 = vector.shape_cast %132 : vector<4x8xf32> to vector<4x8x1xf32>
    %134 = tpu.reciprocal %133 {approx = true} : vector<4x8x1xf32> -> vector<4x8x1xf32>
    %135 = vector.broadcast %134 : vector<4x8x1xf32> to vector<4x8x8xf32>
    %136 = arith.mulf %131, %135 : vector<4x8x8xf32>
    %cst_32 = arith.constant dense<0.000000e+00> : vector<4x8x8xf32>
    %137 = tpu.matmul %136, %116, %cst_32 {dimension_numbers = #tpu.dot_dimension_numbers<[2], [1], [1], [2], [0, 0, 0, 1, 1, 2], [0], [0]>} : vector<4x8x8xf32>, vector<4x8x8xf32>, vector<4x8x8xf32> -> vector<4x8x8xf32>
    %138 = vector.extract_strided_slice %137 {offsets = [0, 0, 0], sizes = [1, 8, 8], strides = [1, 1, 1]} : vector<4x8x8xf32> to vector<1x8x8xf32>
    %139 = vector.shape_cast %138 : vector<1x8x8xf32> to vector<8x8xf32>
    %140 = vector.extract_strided_slice %137 {offsets = [1, 0, 0], sizes = [1, 8, 8], strides = [1, 1, 1]} : vector<4x8x8xf32> to vector<1x8x8xf32>
    %141 = vector.shape_cast %140 : vector<1x8x8xf32> to vector<8x8xf32>
    %142 = vector.extract_strided_slice %137 {offsets = [2, 0, 0], sizes = [1, 8, 8], strides = [1, 1, 1]} : vector<4x8x8xf32> to vector<1x8x8xf32>
    %143 = vector.shape_cast %142 : vector<1x8x8xf32> to vector<8x8xf32>
    %144 = vector.extract_strided_slice %137 {offsets = [3, 0, 0], sizes = [1, 8, 8], strides = [1, 1, 1]} : vector<4x8x8xf32> to vector<1x8x8xf32>
    %145 = vector.shape_cast %144 : vector<1x8x8xf32> to vector<8x8xf32>
    %146 = tpu.concatenate %139, %141, %143, %145 in 1 : vector<8x8xf32>, vector<8x8xf32>, vector<8x8xf32>, vector<8x8xf32> -> vector<8x32xf32>
    %147 = tpu.concatenate %97, %146 in 0 : vector<8x32xf32>, vector<8x32xf32> -> vector<16x32xf32>
    %cst_33 = arith.constant dense<0.000000e+00> : vector<16x128xf32>
    %148 = tpu.matmul %147, %9, %cst_33 {dimension_numbers = #tpu.dot_dimension_numbers<[1], [0], [0], [1], [0, 0, 1, 1], [], []>} : vector<16x32xf32>, vector<32x128xf32>, vector<16x128xf32> -> vector<16x128xf32>
    %149 = vector.broadcast %11 : vector<1x128xf32> to vector<16x128xf32>
    %150 = arith.addf %148, %149 : vector<16x128xf32>
    %c0_34 = arith.constant 0 : index
    %c0_35 = arith.constant 0 : index
    %c0_36 = arith.constant 0 : index
    %151 = vector.load %arg7[%c0_34, %c0_35, %c0_36] : memref<1x16x128xf32, #tpu.memory_space<vmem>>, vector<1x16x128xf32>
    %152 = vector.shape_cast %151 : vector<1x16x128xf32> to vector<16x128xf32>
    %153 = vector.shape_cast %150 : vector<16x128xf32> to vector<1x16x128xf32>
    tpu.vector_store %arg7[%c0_34, %c0_35, %c0_36], %153 {strides = array<i32>} : memref<1x16x128xf32, #tpu.memory_space<vmem>>, vector<1x16x128xf32>,
    return
  }
  func.func @transform_0(%arg0: i32) -> (i32, i32, i32) {
    %c0_i32 = arith.constant 0 : i32
    %c0_i32_0 = arith.constant 0 : i32
    %c0_i32_1 = arith.constant 0 : i32
    return %arg0, %c0_i32, %c0_i32_0 : i32, i32, i32
  }
  func.func @transform_1(%arg0: i32) -> (i32, i32, i32) {
    %c0_i32 = arith.constant 0 : i32
    %c0_i32_0 = arith.constant 0 : i32
    %c0_i32_1 = arith.constant 0 : i32
    return %arg0, %c0_i32, %c0_i32_0 : i32, i32, i32
  }
  func.func @transform_2(%arg0: i32) -> (i32, i32, i32) {
    %c0_i32 = arith.constant 0 : i32
    %c0_i32_0 = arith.constant 0 : i32
    %c0_i32_1 = arith.constant 0 : i32
    return %arg0, %c0_i32, %c0_i32_0 : i32, i32, i32
  }
  func.func @transform_3(%arg0: i32) -> (i32, i32, i32) {
    %c0_i32 = arith.constant 0 : i32
    %c0_i32_0 = arith.constant 0 : i32
    %c0_i32_1 = arith.constant 0 : i32
    return %arg0, %c0_i32, %c0_i32_0 : i32, i32, i32
  }
  func.func @transform_4(%arg0: i32) -> (i32, i32, i32) {
    %c0_i32 = arith.constant 0 : i32
    %c0_i32_0 = arith.constant 0 : i32
    %c0_i32_1 = arith.constant 0 : i32
    return %arg0, %c0_i32, %c0_i32_0 : i32, i32, i32
  }
  func.func @transform_5(%arg0: i32) -> (i32, i32, i32) {
    %c0_i32 = arith.constant 0 : i32
    %c0_i32_0 = arith.constant 0 : i32
    %c0_i32_1 = arith.constant 0 : i32
    return %arg0, %c0_i32, %c0_i32_0 : i32, i32, i32
  }
  func.func @transform_6(%arg0: i32) -> (i32, i32, i32) {
    %c0_i32 = arith.constant 0 : i32
    %c0_i32_0 = arith.constant 0 : i32
    %c0_i32_1 = arith.constant 0 : i32
    return %arg0, %c0_i32, %c0_i32_0 : i32, i32, i32
  }
}

</mosaic_0001>

<bundles_post_ra>
// kernel: attentive_optimizer_forward.1
= control target key start
LH: loop header
LB: loop body
LE: loop exit
PB: predicated region body
PF: predicated region fallthrough
CT: control target
= control target key end

     0   :  { %s2185_s21 = smov 0   ;;  %s2466_s0 = inlined_call_operand.vmem [shape: bf16[2,16,768], index: 0, kind: input, shape index: {}]   ;;  %s2467_s1 = inlined_call_operand.vmem [shape: bf16[2,768,96], index: 1, kind: input, shape index: {}]   ;;  %s2468_s2 = inlined_call_operand.vmem [shape: f32[2,288,96], index: 2, kind: input, shape index: {}]   ;;  %s2469_s3 = inlined_call_operand.vmem [shape: f32[2,4,96], index: 3, kind: input, shape index: {}]   ;;  %s2470_s4 = inlined_call_operand.vmem [shape: f32[2,32,128], index: 4, kind: input, shape index: {}]   ;;  %s2471_s5 = inlined_call_operand.vmem [shape: f32[2,1,128], index: 5, kind: input, shape index: {}]   ;;  %s2472_s6 = inlined_call_operand.vmem [shape: f32[2,16,128], index: 6, kind: output, shape index: {}]  }
   0x1 LB: > { %s1745_s22 = sadd.s32 4294967295, %s2140_s21   ;;  %p1749_p0 = scmp.ge.s32.totalorder %s2140_s21, 1  ;;  %s2140_s21 = sphi %s2185_s21, %s16_s21  }
   0x2   : > { %p259_p1 = scmp.lt.s32.totalorder %s2140_s21, 3 }
   0x4   : > { %p260_p2 = pnand %p1749_p0, %p259_p1 }
   0x5   : > { %p311_p3 = scmp.lt.s32.totalorder (!%p260_p2), %s1745_s22, 1  ;;  %s2142_s15 = smov (!%p260_p2), 64  }
   0x6   : > { %263 = sbr.rel (%p260_p2) target bundleno = 2401 (0x961), region = 44  ;;  %s2143_s16 = smov (!%p260_p2), 112  }
   0x7   : > { %s2144_s17 = smov (!%p260_p2), 104   ;;  %s2145_s18 = smov (!%p260_p2), 120  }
   0x8   : > { %s2146_s19 = smov (!%p260_p2), 96   ;;  %s2147_s20 = smov (!%p260_p2), 16  }
   0x9   : > { %s2149_s24 = smov (!%p260_p2), 24  }
   0xb   : > { %s2474_s22 = smov (!%p311_p3, %s1745_s22), 1  ;;  %vm893_vm0 = vcmask 785408   ;;  %vm957_vm1 = vcmask 785920   ;;  %vm978_vm2 = vcmask 261120   ;;  %vm1015_vm7 = vcmask 523264  }
   0xc   : > { %s2065_s23 = smul.u32 384, %s2474_s22  ;;  %s1753_s11 = sshll.u32 %s2474_s22, 2  ;;  %vm1057_vm8 = vcmask 64512   ;;  %vm1321_vm13 = vcmask 130048   ;;  %vm1323_vm14 = vcmask 195584  }
   0xd   : > { %s2064_s27 = smul.u32 48, %s2474_s22  ;;  %s329_s14 = scalar_lea.vmem %s2469_s3, %s1753_s11 }
   0xe   : > { %s2199_s26 = scalar_lea.vmem %s2467_s1, %s2065_s23  ;;  %s2066_s7 = smul.u32 288, %s2474_s22 }
   0xf   : > { %v2023_v0 = vld [vmem:[%s2199_s26 + $0x38] sm:$0xff]  ;;  %v2022_v4 = vld [vmem:[%s2199_s26 + $0x30] sm:$0xff]  ;;  %v2021_v8 = vld [vmem:[%s2199_s26 + $0x28] sm:$0xff]  ;;  %s2233_s30 = scalar_lea.vmem %s2466_s0, %s2064_s27  ;;  %s2148_s23 = smov 8  }
  0x10   : > { %v2031_v1 = vld [vmem:[%s2199_s26 + $0x78] sm:$0xff]  ;;  %806 = vmatpush.bf16.msra.mxu0 %v2023_v0  ;;  %v2030_v5 = vld [vmem:[%s2199_s26 + $0x70] sm:$0xff]  ;;  %v2029_v9 = vld [vmem:[%s2199_s26 + $0x68] sm:$0xff]  ;;  %s2271_s10 = scalar_lea.vmem %s2468_s2, %s2066_s7  ;;  %s2008_s25 = sshll.u32 %s2474_s22, 5 }
  0x11   : > { %v2039_v2 = vld [vmem:[%s2199_s26 + $0xb8] sm:$0xff]  ;;  %820 = vmatpush.bf16.msra.mxu1 %v2031_v1  ;;  %v2038_v6 = vld [vmem:[%s2199_s26 + $0xb0] sm:$0xff]  ;;  %v2037_v10 = vld [vmem:[%s2199_s26 + $0xa8] sm:$0xff]  ;;  %s334_s28 = scalar_lea.vmem %s2470_s4, %s2008_s25  ;;  %s337_s7 = scalar_lea.vmem %s2471_s5, %s2474_s22 }
  0x12   : > { %v2047_v3 = vld [vmem:[%s2199_s26 + $0xf8] sm:$0xff]  ;;  %834 = vmatpush.bf16.msra.mxu2 %v2039_v2  ;;  %v2046_v7 = vld [vmem:[%s2199_s26 + $0xf0] sm:$0xff]  ;;  %v2045_v11 = vld [vmem:[%s2199_s26 + $0xe8] sm:$0xff]  ;;  %s2009_s8 = sshll.u32 %s2474_s22, 4 }
  0x13   : > { %848 = vmatpush.bf16.msra.mxu3 %v2047_v3  ;;  %v2020_v12 = vld [vmem:[%s2199_s26 + $0x20] sm:$0xff]  ;;  %v2019_v16 = vld [vmem:[%s2199_s26 + $0x18] sm:$0xff]  ;;  %v2018_v20 = vld [vmem:[%s2199_s26 + $0x10] sm:$0xff]  ;;  %s342_s11 = scalar_lea.vmem %s2472_s6, %s2009_s8 }
  0x14   : > { %807 = vmatpush.bf16.msra.mxu0 %v2022_v4  ;;  %v2028_v13 = vld [vmem:[%s2199_s26 + $0x60] sm:$0xff]  ;;  %v2027_v17 = vld [vmem:[%s2199_s26 + $0x58] sm:$0xff]  ;;  %v2026_v21 = vld [vmem:[%s2199_s26 + $0x50] sm:$0xff] }
  0x15   : > { %821 = vmatpush.bf16.msra.mxu1 %v2030_v5  ;;  %v2036_v14 = vld [vmem:[%s2199_s26 + $0xa0] sm:$0xff]  ;;  %v2035_v18 = vld [vmem:[%s2199_s26 + $0x98] sm:$0xff]  ;;  %v2034_v22 = vld [vmem:[%s2199_s26 + $0x90] sm:$0xff] }
  0x16   : > { %835 = vmatpush.bf16.msra.mxu2 %v2038_v6  ;;  %v2044_v15 = vld [vmem:[%s2199_s26 + $0xe0] sm:$0xff]  ;;  %v2043_v19 = vld [vmem:[%s2199_s26 + $0xd8] sm:$0xff]  ;;  %v2042_v23 = vld [vmem:[%s2199_s26 + $0xd0] sm:$0xff] }
  0x17   : > { %849 = vmatpush.bf16.msra.mxu3 %v2046_v7  ;;  %v2017_v24 = vld [vmem:[%s2199_s26 + $0x8] sm:$0xff]  ;;  %v2016_v28 = vld [vmem:[%s2199_s26] sm:$0xff]  ;;  %v2013_v31 = vld [vmem:[%s2233_s30 + $0x14] sm:$0xf0] }
  0x18   : > { %808 = vmatpush.bf16.msra.mxu0 %v2021_v8  ;;  %v2025_v25 = vld [vmem:[%s2199_s26 + $0x48] sm:$0xff]  ;;  %v2024_v29 = vld [vmem:[%s2199_s26 + $0x40] sm:$0xff]  ;;  %v1762_v33 = vld [vmem:[%s2233_s30 + $0x18] sm:$0xf0] }
  0x19   : > { %822 = vmatpush.bf16.msra.mxu1 %v2029_v9  ;;  %v2033_v26 = vld [vmem:[%s2199_s26 + $0x88] sm:$0xff]  ;;  %v1760_v30 = vld [vmem:[%s2233_s30] sm:$0xf]  ;;  %v2010_v32 = vld [vmem:[%s2233_s30 + $0x4] sm:$0xf] }
  0x1a   : > { %836 = vmatpush.bf16.msra.mxu2 %v2037_v10  ;;  %v2041_v27 = vld [vmem:[%s2199_s26 + $0xc8] sm:$0xff]  ;;  %v2055_v34 = vld [vmem:[%s2199_s26 + $0x138] sm:$0xff]  ;;  %v2032_v36 = vld [vmem:[%s2199_s26 + $0x80] sm:$0xff]  ;;  %v1761_v40 = vor.u32 %v2013_v31, %v1760_v30  ;;  %v1765_v43 = vor.u32 %v2010_v32, %v1762_v33 }
  0x1b   : > { %850 = vmatpush.bf16.msra.mxu3 %v2045_v11  ;;  %v2063_v35 = vld [vmem:[%s2199_s26 + $0x178] sm:$0xff]  ;;  %v2040_v37 = vld [vmem:[%s2199_s26 + $0xc0] sm:$0xff]  ;;  %v1768_v38 = vld [vmem:[%s2233_s30 + $0x8] sm:$0xf] }
  0x1c   : > { %809 = vmatpush.bf16.msra.mxu0 %v2020_v12  ;;  %v2014_v39 = vld [vmem:[%s2233_s30 + $0x1c] sm:$0xf0]  ;;  %v2011_v41 = vld [vmem:[%s2233_s30 + $0xc] sm:$0xf]  ;;  %v1770_v42 = vld [vmem:[%s2233_s30 + $0x20] sm:$0xf0] }
  0x1d   : > { %823 = vmatpush.bf16.msra.mxu1 %v2028_v13  ;;  %v2054_v44 = vld [vmem:[%s2199_s26 + $0x130] sm:$0xff]  ;;  %v1769_v46 = vor.u32 %v2014_v39, %v1768_v38  ;;  %v1773_v47 = vor.u32 %v2011_v41, %v1770_v42  ;;  %v2053_v48 = vld [vmem:[%s2199_s26 + $0x128] sm:$0xff]  ;;  %v2052_v50 = vld [vmem:[%s2199_s26 + $0x120] sm:$0xff] }
  0x1e   : > { %837 = vmatpush.bf16.msra.mxu2 %v2036_v14  ;;  %v2062_v45 = vld [vmem:[%s2199_s26 + $0x170] sm:$0xff]  ;;  %v2061_v49 = vld [vmem:[%s2199_s26 + $0x168] sm:$0xff]  ;;  %v2060_v51 = vld [vmem:[%s2199_s26 + $0x160] sm:$0xff] }
  0x1f   : > { %851 = vmatpush.bf16.msra.mxu3 %v2044_v15  ;;  %v2051_v52 = vld [vmem:[%s2199_s26 + $0x118] sm:$0xff]  ;;  %v2050_v54 = vld [vmem:[%s2199_s26 + $0x110] sm:$0xff]  ;;  %v2049_v56 = vld [vmem:[%s2199_s26 + $0x108] sm:$0xff] }
  0x20   : > { %810 = vmatpush.bf16.msra.mxu0 %v2019_v16  ;;  %v2059_v53 = vld [vmem:[%s2199_s26 + $0x158] sm:$0xff]  ;;  %v2058_v55 = vld [vmem:[%s2199_s26 + $0x150] sm:$0xff]  ;;  %v2057_v57 = vld [vmem:[%s2199_s26 + $0x148] sm:$0xff] }
  0x21   : > { %824 = vmatpush.bf16.msra.mxu1 %v2027_v17  ;;  %v2048_v58 = vld [vmem:[%s2199_s26 + $0x100] sm:$0xff]  ;;  %v1776_v60 = vld [vmem:[%s2233_s30 + $0x10] sm:$0xf]  ;;  %v2015_v61 = vld [vmem:[%s2233_s30 + $0x24] sm:$0xf0] }
  0x22   : > { %838 = vmatpush.bf16.msra.mxu2 %v2035_v18  ;;  %v2056_v59 = vld [vmem:[%s2199_s26 + $0x140] sm:$0xff]  ;;  %v2012_v62 = vld [vmem:[%s2233_s30 + $0x14] sm:$0xf]  ;;  %v1778_v63 = vld [vmem:[%s2233_s30 + $0x28] sm:$0xf0]  ;;  %v1777_v0 = vor.u32 %v2015_v61, %v1776_v60 }
  0x23   : > { %852 = vmatpush.bf16.msra.mxu3 %v2043_v19  ;;  %v1781_v1 = vor.u32 %v2012_v62, %v1778_v63  ;;  %v456_v2 = vld [vmem:[%s2271_s10 + $0x58] sm:$0xff]  ;;  %v455_v3 = vld [vmem:[%s2271_s10 + $0x50] sm:$0xff]  ;;  %v454_v4 = vld [vmem:[%s2271_s10 + $0x48] sm:$0xff] }
  0x24   : > { %811 = vmatpush.bf16.msra.mxu0 %v2018_v20  ;;  %v453_v5 = vld [vmem:[%s2271_s10 + $0x40] sm:$0xff]  ;;  %v452_v6 = vld [vmem:[%s2271_s10 + $0x38] sm:$0xff]  ;;  %v451_v7 = vld [vmem:[%s2271_s10 + $0x30] sm:$0xff] }
  0x25   : > { %825 = vmatpush.bf16.msra.mxu1 %v2026_v21  ;;  %v450_v8 = vld [vmem:[%s2271_s10 + $0x28] sm:$0xff]  ;;  %v449_v9 = vld [vmem:[%s2271_s10 + $0x20] sm:$0xff]  ;;  %v448_v10 = vld [vmem:[%s2271_s10 + $0x18] sm:$0xff] }
  0x26   : > { %839 = vmatpush.bf16.msra.mxu2 %v2034_v22  ;;  %v447_v11 = vld [vmem:[%s2271_s10 + $0x10] sm:$0xff]  ;;  %v446_v12 = vld [vmem:[%s2271_s10 + $0x8] sm:$0xff]  ;;  %v445_v13 = vld [vmem:[%s2271_s10] sm:$0xff] }
  0x27   : > { %853 = vmatpush.bf16.msra.mxu3 %v2042_v23  ;;  %v2289_v14 = vld [vmem:[%s329_s14] sm:$0xf]  ;;  %v468_v18 = vld [vmem:[%s2271_s10 + $0xb8] sm:$0xff]  ;;  %v467_v19 = vld [vmem:[%s2271_s10 + $0xb0] sm:$0xff] }
  0x28   : > { %812 = vmatpush.bf16.msra.mxu0 %v2017_v24  ;;  %v487_v17 = vperm.slane %v2289_v14, 0  ;;  %v466_v20 = vld [vmem:[%s2271_s10 + $0xa8] sm:$0xff]  ;;  %v465_v22 = vld [vmem:[%s2271_s10 + $0xa0] sm:$0xff]  ;;  %v464_v24 = vld [vmem:[%s2271_s10 + $0x98] sm:$0xff]  ;;  %v925_v61 = vperm.slane %v2289_v14, 2 }
  0x29   : > { %826 = vmatpush.bf16.msra.mxu1 %v2025_v25  ;;  %v461_v33 = vld [vmem:[%s2271_s10 + $0x80] sm:$0xff] }
  0x2a   : > { %840 = vmatpush.bf16.msra.mxu2 %v2033_v26  ;;  %v463_v26 = vld [vmem:[%s2271_s10 + $0x90] sm:$0xff] }
  0x2b   : > { %854 = vmatpush.bf16.msra.mxu3 %v2041_v27 }
  0x2c   : > { %813 = vmatpush.bf16.msra.mxu0 %v2016_v28 }
  0x2d   : > { %827 = vmatpush.bf16.msra.mxu1 %v2024_v29  ;;  %v462_v29 = vld [vmem:[%s2271_s10 + $0x88] sm:$0xff] }
  0x2e   : > { %841 = vmatpush.bf16.msra.mxu2 %v2032_v36 }
  0x2f   : > { %855 = vmatpush.bf16.msra.mxu3 %v2040_v37  ;;  %814 = vmatmul.bf16.vlgmr.msra.gmra.mxu0 %v1761_v40 }
  0x30   : > { %862 = vmatpush.bf16.msrb.mxu0 %v2055_v34  ;;  %828 = vmatmul.bf16.vlgmr.msra.gmra.mxu1 %v1765_v43  ;;  %v460_v34 = vld [vmem:[%s2271_s10 + $0x78] sm:$0xff] }
  0x31   : > { %876 = vmatpush.bf16.msrb.mxu1 %v2063_v35  ;;  %842 = vmatmul.bf16.vlgmr.msra.gmra.mxu2 %v1769_v46 }
  0x32   : > { %856 = vmatmul.bf16.vlgmr.msra.gmra.mxu3 %v1773_v47  ;;  %904 = vmatpush.msrb.mxu2 %v456_v2 }
  0x33   : > { %936 = vmatpush.msrb.mxu3 %v468_v18  ;;  %v473_v18 = vld [vmem:[%s2271_s10 + $0xe0] sm:$0xff] }
  0x34   : > { %863 = vmatpush.bf16.msrb.mxu0 %v2054_v44  ;;  %905 = vmatpush.msrb.mxu2 %v455_v3 }
  0x35   : > { %877 = vmatpush.bf16.msrb.mxu1 %v2062_v45  ;;  %937 = vmatpush.msrb.mxu3 %v467_v19  ;;  %v472_v19 = vld [vmem:[%s2271_s10 + $0xd8] sm:$0xff] }
  0x36   : > { %906 = vmatpush.msrb.mxu2 %v454_v4 }
  0x37   : > { %938 = vmatpush.msrb.mxu3 %v466_v20  ;;  %v471_v20 = vld [vmem:[%s2271_s10 + $0xd0] sm:$0xff] }
  0x38   : > { %864 = vmatpush.bf16.msrb.mxu0 %v2053_v48  ;;  %907 = vmatpush.msrb.mxu2 %v453_v5  ;;  %v480_v5 = vld [vmem:[%s2271_s10 + $0x118] sm:$0xff] }
  0x39   : > { %878 = vmatpush.bf16.msrb.mxu1 %v2061_v49  ;;  %939 = vmatpush.msrb.mxu3 %v465_v22  ;;  %v469_v22 = vld [vmem:[%s2271_s10 + $0xc0] sm:$0xff] }
  0x3a   : > { %908 = vmatpush.msrb.mxu2 %v452_v6  ;;  %v479_v6 = vld [vmem:[%s2271_s10 + $0x110] sm:$0xff] }
  0x3b   : > { %940 = vmatpush.msrb.mxu3 %v464_v24 }
  0x3c   : > { %865 = vmatpush.bf16.msrb.mxu0 %v2052_v50  ;;  %909 = vmatpush.msrb.mxu2 %v451_v7 }
  0x3d   : > { %879 = vmatpush.bf16.msrb.mxu1 %v2060_v51  ;;  %941 = vmatpush.msrb.mxu3 %v463_v26  ;;  %v459_v51 = vld [vmem:[%s2271_s10 + $0x70] sm:$0xff] }
  0x3e   : > { %910 = vmatpush.msrb.mxu2 %v450_v8 }
  0x3f   : > { %942 = vmatpush.msrb.mxu3 %v462_v29 }
  0x40   : > { %866 = vmatpush.bf16.msrb.mxu0 %v2051_v52  ;;  %911 = vmatpush.msrb.mxu2 %v449_v9  ;;  %v458_v52 = vld [vmem:[%s2271_s10 + $0x68] sm:$0xff] }
  0x41   : > { %880 = vmatpush.bf16.msrb.mxu1 %v2059_v53  ;;  %943 = vmatpush.msrb.mxu3 %v461_v33  ;;  %v457_v53 = vld [vmem:[%s2271_s10 + $0x60] sm:$0xff] }
  0x42   : > { %912 = vmatpush.msrb.mxu2 %v448_v10 }
  0x43   : > { %944 = vmatpush.msrb.mxu3 %v460_v34 }
  0x44   : > { %867 = vmatpush.bf16.msrb.mxu0 %v2050_v54  ;;  %913 = vmatpush.msrb.mxu2 %v447_v11  ;;  %v892_v54 = vperm.slane %v2289_v14, 1 }
  0x45   : > { %881 = vmatpush.bf16.msrb.mxu1 %v2058_v55  ;;  %945 = vmatpush.msrb.mxu3 %v459_v51 }
  0x46   : > { %914 = vmatpush.msrb.mxu2 %v446_v12  ;;  %v478_v12 = vld [vmem:[%s2271_s10 + $0x108] sm:$0xff] }
  0x47   : > { %946 = vmatpush.msrb.mxu3 %v458_v52 }
  0x48   : > { %868 = vmatpush.bf16.msrb.mxu0 %v2049_v56  ;;  %915 = vmatpush.msrb.mxu2 %v445_v13  ;;  %v477_v13 = vld [vmem:[%s2271_s10 + $0x100] sm:$0xff] }
  0x49   : > { %882 = vmatpush.bf16.msrb.mxu1 %v2057_v57  ;;  %947 = vmatpush.msrb.mxu3 %v457_v53 }
  0x4a   : > { %1029 = vmatpush.msra.mxu2 %v480_v5 }
  0x4c   : > { %869 = vmatpush.bf16.msrb.mxu0 %v2048_v58  ;;  %1030 = vmatpush.msra.mxu2 %v479_v6 }
  0x4d   : > { %883 = vmatpush.bf16.msrb.mxu1 %v2056_v59 }
  0x4e   : > { %1031 = vmatpush.msra.mxu2 %v478_v12 }
  0x4f   : > { %870 = vmatmul.bf16.vlgmr.msrb.gmra.mxu0 %v1777_v0 }
  0x50   : > { %884 = vmatmul.bf16.vlgmr.msrb.gmra.mxu1 %v1781_v1  ;;  %1032 = vmatpush.msra.mxu2 %v477_v13 }
  0xac   : > { %v815_v15 = vpop.f32.mrf.mxu0 }
  0xad   : > { %v829_v16 = vpop.f32.mrf.mxu1  ;;  %v816_v21 = vadd.f32 %v815_v15, %v487_v17  ;;  %v476_v15 = vld [vmem:[%s2271_s10 + $0xf8] sm:$0xff] }
  0xae   : > { %1033 = vmatpush.msra.mxu2 %v476_v15 }
  0xaf   : > { %v830_v25 = vadd.f32 %v829_v16, %v816_v21  ;;  %v475_v16 = vld [vmem:[%s2271_s10 + $0xf0] sm:$0xff]  ;;  %v470_v21 = vld [vmem:[%s2271_s10 + $0xc8] sm:$0xff] }
  0xb0   : > { %1034 = vmatpush.msra.mxu2 %v475_v16 }
  0xb4   : > { %v843_v23 = vpop.f32.mrf.mxu2  ;;  %v817_v27 = vpop.f32.mrf.mxu0 }
  0xb5   : > { %v831_v28 = vpop.f32.mrf.mxu1  ;;  %v857_v30 = vpop.f32.mrf.mxu3  ;;  %v844_v31 = vadd.f32 %v843_v23, %v830_v25  ;;  %v818_v32 = vadd.f32 %v817_v27, %v487_v17  ;;  %v474_v17 = vld [vmem:[%s2271_s10 + $0xe8] sm:$0xff] }
  0xb6   : > { %1035 = vmatpush.msra.mxu2 %v474_v17 }
  0xb7   : > { %v858_v35 = vadd.f32 %v857_v30, %v844_v31  ;;  %v832_v36 = vadd.f32 %v831_v28, %v818_v32 }
  0xb8   : > { %1036 = vmatpush.msra.mxu2 %v473_v18 }
  0xba   : > { %1037 = vmatpush.msra.mxu2 %v472_v19 }
  0xbc   : > { %v845_v37 = vpop.f32.mrf.mxu2  ;;  %1038 = vmatpush.msra.mxu2 %v471_v20 }
  0xbd   : > { %v846_v41 = vadd.f32 %v845_v37, %v832_v36  ;;  %v859_v43 = vpop.f32.mrf.mxu3 }
  0xbe   : > { %1039 = vmatpush.msra.mxu2 %v470_v21 }
  0xbf   : > { %v860_v45 = vadd.f32 %v859_v43, %v846_v41  ;;  %v1018_v43 = vperm.slane %v2289_v14, 3 }
  0xc0   : > { %1040 = vmatpush.msra.mxu2 %v469_v22 }
  0xcc   : > { %v871_v38 = vpop.f32.mrf.mxu0 }
  0xcd   : > { %v885_v39 = vpop.f32.mrf.mxu1  ;;  %v872_v40 = vadd.f32 %v871_v38, %v858_v35 }
  0xcf   : > { %v886_v42 = vadd.f32 %v885_v39, %v872_v40 }
  0xd1   : > { %v890_v44 = vmax.f32 %v886_v42, 0.0 }
  0xd3   : > { %1974 = vmatmul.msk.f32.vlgmr.msrb.gmra.mxu2 %vm893_vm0, %v890_v44 }
  0xd4   : > { %v873_v46 = vpop.f32.mrf.mxu0 }
  0xd5   : > { %v874_v47 = vadd.f32 %v873_v46, %v860_v45  ;;  %v887_v48 = vpop.f32.mrf.mxu1 }
  0xd7   : > { %v888_v49 = vadd.f32 %v887_v48, %v874_v47 }
  0xd9   : > { %v891_v50 = vmax.f32 %v888_v49, 0.0 }
  0xdb   : > { %1975 = vmatmul.msk.f32.gmra.mxu2 %vm893_vm0, %v891_v50 }
 0x156   : > { %v917_v55 = vpop.f32.mrf.mxu2 }
 0x157   : > { %v918_v56 = vadd.f32 %v917_v55, %v892_v54 }
 0x159   : > { %v923_v57 = vmax.f32 %v918_v56, 0.0 }
 0x15b   : > { %1976 = vmatmul.msk.f32.vlgmr.msrb.gmra.mxu3 %vm893_vm0, %v923_v57 }
 0x15e   : > { %v920_v58 = vpop.f32.mrf.mxu2 }
 0x15f   : > { %v921_v59 = vadd.f32 %v920_v58, %v892_v54 }
 0x161   : > { %v924_v60 = vmax.f32 %v921_v59, 0.0 }
 0x163   : > { %1977 = vmatmul.msk.f32.gmra.mxu3 %vm893_vm0, %v924_v60 }
 0x1de   : > { %v949_v62 = vpop.f32.mrf.mxu3 }
 0x1df   : > { %v2310_v63 = vadd.f32 %v949_v62, %v925_v61 }
 0x1e1   : > { %v958_v0 = vsel %vm957_vm1, %v2310_v63, -inf  ;;  %v955_v37 = vmax.f32 %v2310_v63, 0.0 }
 0x1e2   : > { %959 = vmax.xlane.f32.xlu0 %v958_v0 }
 0x1e6   : > { %v952_v9 = vpop.f32.mrf.mxu3 }
 0x1e7   : > { %v2319_v10 = vadd.f32 %v952_v9, %v925_v61 }
 0x1e9   : > { %v961_v11 = vsel %vm957_vm1, %v2319_v10, -inf  ;;  %v956_v56 = vmax.f32 %v2319_v10, 0.0 }
 0x255   : > { %v960_v1 = vpop.xlane.xlu0 %959 }
 0x256   : > { %v964_v2 = vsub.f32 %v2310_v63, %v960_v1 }
 0x258   : > { %v966_v3 = vmul.f32 1.442695, %v964_v2 }
 0x25a   : > { %2094 = vpow2.f32 %v966_v3 }
 0x260   : > { %v2095_v4 = vpop.eup %2094 }
 0x261   : > { %972 = vrot.lane.b32.xlu0 %v2095_v4, %s2142_s15 }
 0x2d3   : > { %v973_v7 = vpop.permute.xlu0 %972 }
 0x2d4   : > { %v979_v8 = vsel %vm978_vm2, %v973_v7, 0.0 }
 0x2d5   : > { %980 = vadd.xlane.f32.xlu1 %v979_v8 }
 0x2dd   : > { %962 = vmax.xlane.f32.xlu1 %v961_v11 }
 0x348   : > { %v981_v23 = vpop.xlane.xlu1 %980 }
 0x349   : > { %2096 = vrcp.f32 %v981_v23  ;;  %v996_v29 = vand.u32 2147483648, %v981_v23  ;;  %v994_v32 = vand.u32 2147483647, %v981_v23  ;;  %vm990_vm4 = vweird.f32 %v981_v23 }
 0x34b   : > { %v997_v34 = vor.u32 1.1754944e-38, %v996_v29  ;;  %vm995_vm6 = vcmp.eq.f32.partialorder %v994_v32, 8.507059e+37 }
 0x34f   : > { %v2097_v24 = vpop.eup %2096 }
 0x350   : > { %v986_v25 = vmul.f32 %v2097_v24, %v981_v23  ;;  %v963_v26 = vpop.xlane.xlu1 %962  ;;  %vm991_vm3 = vweird.f32 %v2097_v24 }
 0x351   : > { %v965_v27 = vsub.f32 %v2319_v10, %v963_v26  ;;  %vm992_vm5 = vmor %vm990_vm4, %vm991_vm3 }
 0x352   : > { %v987_v28 = vsub.f32 1.0, %v986_v25 }
 0x353   : > { %v968_v30 = vmul.f32 1.442695, %v965_v27 }
 0x354   : > { %v988_v31 = vmul.f32 %v2097_v24, %v987_v28 }
 0x355   : > { %2098 = vpow2.f32 %v968_v30 }
 0x356   : > { %v989_v33 = vadd.f32 %v2097_v24, %v988_v31 }
 0x358   : > { %v993_v35 = vsel %vm992_vm5, %v2097_v24, %v989_v33 }
 0x359   : > { %v998_v36 = vsel %vm995_vm6, %v997_v34, %v993_v35 }
 0x35a   : > { %v999_v38 = vmul.f32 %v2095_v4, %v998_v36 }
 0x35b   : > { %v2099_v39 = vpop.eup %2098 }
 0x35c   : > { %974 = vrot.lane.b32.xlu2 %v2099_v39, %s2142_s15  ;;  %v1016_v40 = vsel %vm1015_vm7, %v955_v37, %v999_v38 }
 0x35d   : > { %1978 = vmatmul.msk.f32.vlgmr.msra.gmra.mxu2 %vm893_vm0, %v1016_v40 }
 0x3b6   : > { %v975_v41 = vpop.permute.xlu2 %974 }
 0x3b7   : > { %v982_v42 = vsel %vm978_vm2, %v975_v41, 0.0 }
 0x3b8   : > { %983 = vadd.xlane.f32.xlu1 %v982_v42 }
 0x3e0   : > { %v1042_v44 = vpop.f32.mrf.mxu2 }
 0x3e1   : > { %v2340_v45 = vadd.f32 %v1042_v44, %v1018_v43 }
 0x3e3   : > { %1051 = vrot.lane.b32.xlu2 %v2340_v45, %s2143_s16  ;;  %1980 = vmatpush.xpose.msk.msra.mxu3 %vm1057_vm8, %v2340_v45 }
 0x3eb   : > { %1053 = vrot.lane.b32.xlu2 %v2340_v45, %s2144_s17 }
 0x3f3   : > { %1055 = vrot.lane.b32.xlu2 %v2340_v45, %s2142_s15 }
 0x3fb   : > { %1049 = vrot.lane.b32.xlu2 %v2340_v45, %s2145_s18 }
 0x42b   : > { %v984_v14 = vpop.xlane.xlu1 %983 }
 0x42c   : > { %2100 = vrcp.f32 %v984_v14  ;;  %v1011_v49 = vand.u32 2147483648, %v984_v14  ;;  %v1009_v51 = vand.u32 2147483647, %v984_v14  ;;  %vm1005_vm10 = vweird.f32 %v984_v14 }
 0x42e   : > { %v1012_v53 = vor.u32 1.1754944e-38, %v1011_v49  ;;  %vm1010_vm12 = vcmp.eq.f32.partialorder %v1009_v51, 8.507059e+37 }
 0x432   : > { %v2101_v46 = vpop.eup %2100 }
 0x433   : > { %v1001_v47 = vmul.f32 %v2101_v46, %v984_v14  ;;  %vm1006_vm9 = vweird.f32 %v2101_v46 }
 0x434   : > { %vm1007_vm11 = vmor %vm1005_vm10, %vm1006_vm9 }
 0x435   : > { %v1002_v48 = vsub.f32 1.0, %v1001_v47 }
 0x437   : > { %v1003_v50 = vmul.f32 %v2101_v46, %v1002_v48 }
 0x439   : > { %v1004_v52 = vadd.f32 %v2101_v46, %v1003_v50 }
 0x43b   : > { %v1008_v54 = vsel %vm1007_vm11, %v2101_v46, %v1004_v52 }
 0x43c   : > { %v1013_v55 = vsel %vm1010_vm12, %v1012_v53, %v1008_v54 }
 0x43d   : > { %v1052_v57 = vpop.permute.xlu2 %1051  ;;  %v1014_v58 = vmul.f32 %v2099_v39, %v1013_v55 }
 0x43e   : > { %1984 = vmatpush.xpose.msk.msrb.mxu2 %vm1057_vm8, %v1052_v57  ;;  %1108 = vrot.lane.b32.xlu1 %v1052_v57, %s2142_s15  ;;  %v2083_v18 = vpack.i.bf16 %v2340_v45, %v1052_v57 }
 0x43f   : > { %v1017_v59 = vsel %vm1015_vm7, %v956_v56, %v1014_v58 }
 0x440   : > { %1979 = vmatmul.msk.f32.gmra.mxu2 %vm893_vm0, %v1017_v59 }
 0x445   : > { %v1054_v60 = vpop.permute.xlu2 %1053 }
 0x446   : > { %1134 = vrot.lane.b32.xlu0 %v1054_v60, %s2142_s15  ;;  %1986 = vmatpush.xpose.msk.msrb.mxu3 %vm1057_vm8, %v1054_v60 }
 0x44d   : > { %v1056_v61 = vpop.permute.xlu2 %1055 }
 0x44e   : > { %1981 = vmatmul.msk.f32.vlgmr.msra.gmra.mxu3 %vm1057_vm8, %v1056_v61 }
 0x455   : > { %v1050_v62 = vpop.permute.xlu2 %1049 }
 0x456   : > { %1982 = vmatpush.xpose.msk.msra.mxu0 %vm1057_vm8, %v1050_v62  ;;  %1082 = vrot.lane.b32.xlu0 %v1050_v62, %s2142_s15 }
 0x4b0   : > { %v1109_v63 = vpop.permute.xlu1 %1108 }
 0x4b1   : > { %1985 = vmatmul.msk.f32.vlgmr.msrb.gmra.mxu2 %vm1057_vm8, %v1109_v63 }
 0x4b8   : > { %v1135_v0 = vpop.permute.xlu0 %1134 }
 0x4b9   : > { %1987 = vmatmul.msk.f32.vlgmr.msrb.gmra.mxu3 %vm1057_vm8, %v1135_v0 }
 0x4c3   : > { %v1045_v4 = vpop.f32.mrf.mxu2 }
 0x4c4   : > { %v2366_v5 = vadd.f32 %v1045_v4, %v1018_v43 }
 0x4c8   : > { %v1083_v1 = vpop.permute.xlu0 %1082 }
 0x4c9   : > { %1983 = vmatmul.msk.f32.vlgmr.msra.gmra.mxu0 %vm1057_vm8, %v1083_v1 }
 0x4d1   : > { %v1079_v2 = vpop.f32.mrf.mxu3 }
 0x4d2   : > { %v1160_v3 = vsel %vm1057_vm8, %v1079_v2, -inf }
 0x4d3   : > { %1161 = vmax.xlane.f32.xlu0 %v1160_v3 }
 0x4e7   : > { %1328 = vrot.lane.b32.xlu0 %v2366_v5, %s2143_s16 }
 0x534   : > { %v1131_v6 = vpop.f32.mrf.mxu2 }
 0x535   : > { %v1166_v7 = vsel %vm1057_vm8, %v1131_v6, -inf }
 0x536   : > { %1167 = vmax.xlane.f32.xlu2 %v1166_v7 }
 0x53c   : > { %v1157_v8 = vpop.f32.mrf.mxu3 }
 0x53d   : > { %v1169_v9 = vsel %vm1057_vm8, %v1157_v8, -inf }
 0x53e   : > { %1170 = vmax.xlane.f32.xlu1 %v1169_v9 }
 0x546   : > { %v1162_v10 = vpop.xlane.xlu0 %1161  ;;  %v1105_v12 = vpop.f32.mrf.mxu0 }
 0x547   : > { %v1172_v11 = vsub.f32 %v1079_v2, %v1162_v10  ;;  %v1163_v15 = vsel %vm1057_vm8, %v1105_v12, -inf }
 0x549   : > { %v1176_v13 = vmul.f32 1.442695, %v1172_v11 }
 0x54b   : > { %2102 = vpow2.f32 %v1176_v13 }
 0x54e   : > { %1326 = vrot.lane.b32.xlu2 %v2366_v5, %s2145_s18 }
 0x551   : > { %v2103_v16 = vpop.eup %2102 }
 0x552   : > { %v1184_v17 = vsel %vm1057_vm8, %v2103_v16, 0.0 }
 0x557   : > { %1330 = vrot.lane.b32.xlu1 %v2366_v5, %s2144_s17 }
 0x559   : > { %v2381_v19 = vpop.permute.xlu0 %1328 }
 0x577   : > { %1164 = vmax.xlane.f32.xlu2 %v1163_v15 }
 0x581   : > { %1185 = vadd.xlane.f32.xlu1 %v1184_v17 }
 0x58f   : > { %2084 = vrot.lane.b32.xlu2 %v2083_v18, %s2146_s19 }
 0x597   : > { %1282 = vrot.lane.b32.xlu2 %v1054_v60, %s2146_s19 }
 0x59a   : > { %1384 = vrot.lane.b32.xlu1 %v2381_v19, %s2142_s15 }
 0x5a2   : > { %1230 = vrot.lane.b32.xlu1 %v1050_v62, %s2146_s19 }
 0x5a9   : > { %v1168_v20 = vpop.xlane.xlu2 %1167 }
 0x5aa   : > { %v1174_v22 = vsub.f32 %v1131_v6, %v1168_v20 }
 0x5ac   : > { %v1180_v23 = vmul.f32 1.442695, %v1174_v22 }
 0x5ae   : > { %2104 = vpow2.f32 %v1180_v23 }
 0x5b1   : > { %v2386_v21 = vpop.permute.xlu2 %1326  ;;  %v1171_v24 = vpop.xlane.xlu1 %1170 }
 0x5b2   : > { %1994 = vmatpush.xpose.msk.msra.mxu2 %vm1057_vm8, %v2386_v21  ;;  %1358 = vrot.lane.b32.xlu0 %v2386_v21, %s2142_s15  ;;  %v1175_v25 = vsub.f32 %v1157_v8, %v1171_v24  ;;  %v2088_v11 = vpack.i.bf16 %v2381_v19, %v2386_v21 }
 0x5b4   : > { %v1182_v26 = vmul.f32 1.442695, %v1175_v25  ;;  %v2105_v27 = vpop.eup %2104 }
 0x5b5   : > { %v1190_v28 = vsel %vm1057_vm8, %v2105_v27, 0.0 }
 0x5b6   : > { %2106 = vpow2.f32 %v1182_v26 }
 0x5bc   : > { %v2107_v29 = vpop.eup %2106 }
 0x5bd   : > { %v1193_v30 = vsel %vm1057_vm8, %v2107_v29, 0.0 }
 0x5c9   : > { %v2394_v33 = vpop.permute.xlu1 %1330 }
 0x5dc   : > { %1191 = vadd.xlane.f32.xlu0 %v1190_v28 }
 0x5e4   : > { %1194 = vadd.xlane.f32.xlu0 %v1193_v30 }
 0x5ea   : > { %v1165_v31 = vpop.xlane.xlu2 %1164 }
 0x5eb   : > { %v1173_v32 = vsub.f32 %v1105_v12, %v1165_v31 }
 0x5ed   : > { %v1178_v34 = vmul.f32 1.442695, %v1173_v32 }
 0x5ef   : > { %2108 = vpow2.f32 %v1178_v34 }
 0x5f2   : > { %v2085_v35 = vpop.permute.xlu2 %2084 }
 0x5f3   : > { %v2087_v36 = vunpack.i.h.bf16 %v2085_v35  ;;  %v2086_v37 = vunpack.i.l.bf16 %v2085_v35 }
 0x5f4   : > { %v1186_v38 = vpop.xlane.xlu1 %1185 }
 0x5f5   : > { %v2109_v39 = vpop.eup %2108  ;;  %2110 = vrcp.f32 %v1186_v38  ;;  %1225 = vmatpush.msrb.mxu0 %v2087_v36  ;;  %1277 = vmatpush.msra.mxu3 %v2086_v37 }
 0x5f6   : > { %v1187_v40 = vsel %vm1057_vm8, %v2109_v39, 0.0 }
 0x5f7   : > { %1996 = vmatpush.xpose.msk.msrb.mxu3 %vm1057_vm8, %v2381_v19  ;;  %1188 = vadd.xlane.f32.xlu2 %v1187_v40 }
 0x5f8   : > { %1410 = vrot.lane.b32.xlu0 %v2394_v33, %s2142_s15 }
 0x5fa   : > { %v1283_v41 = vpop.permute.xlu2 %1282 }
 0x5fb   : > { %v2111_v42 = vpop.eup %2110  ;;  %1303 = vmatpush.msra.mxu0 %v1283_v41 }
 0x5fc   : > { %v1200_v43 = vmul.f32 %v2111_v42, %v2103_v16 }
 0x5fe   : > { %1988 = vmatmul.msk.f32.vlgmr.msrb.gmra.mxu0 %vm1057_vm8, %v1200_v43 }
 0x5ff   : > { %1998 = vmatpush.xpose.msk.msrb.mxu0 %vm1057_vm8, %v2394_v33 }
 0x600   : > { %1332 = vrot.lane.b32.xlu0 %v2366_v5, %s2142_s15 }
 0x60c   : > { %v1385_v44 = vpop.permute.xlu1 %1384 }
 0x614   : > { %v1231_v45 = vpop.permute.xlu1 %1230 }
 0x615   : > { %1251 = vmatpush.msra.mxu1 %v1231_v45  ;;  %v485_v45 = vld [vmem:[%s334_s28 + $0x18] sm:$0xff] }
 0x617   : > { %1992 = vmatpush.xpose.msk.msrb.mxu1 %vm1057_vm8, %v2366_v5 }
 0x624   : > { %v1359_v14 = vpop.permute.xlu0 %1358 }
 0x625   : > { %1995 = vmatmul.msk.f32.vlgmr.msra.gmra.mxu2 %vm1057_vm8, %v1359_v14  ;;  %v484_v14 = vld [vmem:[%s334_s28 + $0x10] sm:$0xff] }
 0x64f   : > { %v1192_v46 = vpop.xlane.xlu0 %1191 }
 0x650   : > { %2112 = vrcp.f32 %v1192_v46  ;;  %v483_v46 = vld [vmem:[%s334_s28 + $0x8] sm:$0xff] }
 0x656   : > { %v2113_v47 = vpop.eup %2112 }
 0x657   : > { %v1202_v48 = vmul.f32 %v2113_v47, %v2105_v27  ;;  %v1195_v49 = vpop.xlane.xlu0 %1194 }
 0x658   : > { %2114 = vrcp.f32 %v1195_v49  ;;  %v482_v49 = vld [vmem:[%s334_s28] sm:$0xff] }
 0x659   : > { %1990 = vmatmul.msk.f32.vlgmr.msra.gmra.mxu3 %vm1057_vm8, %v1202_v48 }
 0x65e   : > { %v2115_v50 = vpop.eup %2114 }
 0x65f   : > { %v1203_v51 = vmul.f32 %v2115_v50, %v2107_v29 }
 0x661   : > { %1991 = vmatmul.msk.f32.vlgmr.msra.gmra.mxu0 %vm1057_vm8, %v1203_v51  ;;  %1997 = vmatmul.msk.f32.vlgmr.msrb.gmra.mxu3 %vm1057_vm8, %v1385_v44 }
 0x66a   : > { %v1189_v52 = vpop.xlane.xlu2 %1188  ;;  %v1411_v53 = vpop.permute.xlu0 %1410 }
 0x66b   : > { %2116 = vrcp.f32 %v1189_v52  ;;  %1999 = vmatmul.msk.f32.vlgmr.msrb.gmra.mxu0 %vm1057_vm8, %v1411_v53 }
 0x671   : > { %v2117_v54 = vpop.eup %2116 }
 0x672   : > { %v1201_v55 = vmul.f32 %v2117_v54, %v2109_v39  ;;  %v1333_v56 = vpop.permute.xlu0 %1332 }
 0x674   : > { %1989 = vmatmul.msk.f32.vlgmr.msra.gmra.mxu1 %vm1057_vm8, %v1201_v55 }
 0x67b   : > { %v2416_v59 = vpop.f32.mrf.mxu0 }
 0x67c   : > { %1993 = vmatmul.msk.f32.vlgmr.msrb.gmra.mxu1 %vm1057_vm8, %v1333_v56 }
 0x6a8   : > { %v1381_v57 = vpop.f32.mrf.mxu2 }
 0x6a9   : > { %v1439_v58 = vsel %vm1057_vm8, %v1381_v57, -inf }
 0x6aa   : > { %1440 = vmax.xlane.f32.xlu1 %v1439_v58 }
 0x6dc   : > { %v1279_v60 = vpop.f32.mrf.mxu3 }
 0x6de   : > { %v1305_v61 = vpop.f32.mrf.mxu0 }
 0x6e4   : > { %v1407_v62 = vpop.f32.mrf.mxu3 }
 0x6e5   : > { %v1442_v63 = vsel %vm1057_vm8, %v1407_v62, -inf }
 0x6e6   : > { %1443 = vmax.xlane.f32.xlu0 %v1442_v63 }
 0x6e8   : > { %v1433_v0 = vpop.f32.mrf.mxu0 }
 0x6e9   : > { %v1445_v1 = vsel %vm1057_vm8, %v1433_v0, -inf }
 0x6ea   : > { %1446 = vmax.xlane.f32.xlu2 %v1445_v1 }
 0x6f1   : > { %v1253_v2 = vpop.f32.mrf.mxu1 }
 0x6f9   : > { %v1355_v3 = vpop.f32.mrf.mxu1 }
 0x6fa   : > { %v1436_v4 = vsel %vm1057_vm8, %v1355_v3, -inf }
 0x6fb   : > { %1437 = vmax.xlane.f32.xlu2 %v1436_v4 }
 0x71d   : > { %v1441_v6 = vpop.xlane.xlu1 %1440 }
 0x71e   : > { %v1449_v7 = vsub.f32 %v1381_v57, %v1441_v6  ;;  %v2093_v57 = vld [vmem:[%s337_s7] ss:$0 sm:$0xff] }
 0x720   : > { %v1454_v8 = vmul.f32 1.442695, %v1449_v7 }
 0x722   : > { %2118 = vpow2.f32 %v1454_v8 }
 0x728   : > { %v2119_v9 = vpop.eup %2118 }
 0x729   : > { %v1463_v10 = vsel %vm1057_vm8, %v2119_v9, 0.0 }
 0x72a   : > { %1464 = vadd.xlane.f32.xlu1 %v1463_v10 }
 0x743   : > { %2089 = vrot.lane.b32.xlu1 %v2088_v11, %s2146_s19 }
 0x74b   : > { %1313 = vrot.lane.b32.xlu1 %v1279_v60, %s2147_s20 }
 0x759   : > { %v1444_v12 = vpop.xlane.xlu0 %1443 }
 0x75a   : > { %v1450_v13 = vsub.f32 %v1407_v62, %v1444_v12 }
 0x75c   : > { %v1456_v15 = vmul.f32 1.442695, %v1450_v13 }
 0x75d   : > { %v1447_v16 = vpop.xlane.xlu2 %1446 }
 0x75e   : > { %2120 = vpow2.f32 %v1456_v15  ;;  %v1451_v17 = vsub.f32 %v1433_v0, %v1447_v16 }
 0x760   : > { %v1458_v18 = vmul.f32 1.442695, %v1451_v17 }
 0x762   : > { %2122 = vpow2.f32 %v1458_v18 }
 0x764   : > { %v2121_v20 = vpop.eup %2120 }
 0x765   : > { %v1466_v22 = vsel %vm1057_vm8, %v2121_v20, 0.0 }
 0x766   : > { %1467 = vadd.xlane.f32.xlu0 %v1466_v22 }
 0x768   : > { %v2123_v23 = vpop.eup %2122 }
 0x769   : > { %v1469_v19 = vsel %vm1057_vm8, %v2123_v23, 0.0 }
 0x76a   : > { %1470 = vadd.xlane.f32.xlu2 %v1469_v19 }
 0x76e   : > { %v1438_v21 = vpop.xlane.xlu2 %1437 }
 0x76f   : > { %v1448_v24 = vsub.f32 %v1355_v3, %v1438_v21 }
 0x771   : > { %v1452_v25 = vmul.f32 1.442695, %v1448_v24 }
 0x773   : > { %2124 = vpow2.f32 %v1452_v25 }
 0x779   : > { %v2125_v26 = vpop.eup %2124 }
 0x77a   : > { %1558 = vrot.lane.b32.xlu0 %v2394_v33, %s2146_s19  ;;  %v1460_v27 = vsel %vm1057_vm8, %v2125_v26, 0.0 }
 0x77b   : > { %1461 = vadd.xlane.f32.xlu2 %v1460_v27 }
 0x782   : > { %1309 = vrot.lane.b32.xlu0 %v1253_v2, %s2148_s23 }
 0x78a   : > { %1317 = vrot.lane.b32.xlu0 %v1305_v61, %s2149_s24 }
 0x793   : > { %1480 = vrot.lane.b32.xlu2 %v2366_v5, %s2146_s19 }
 0x79d   : > { %v1465_v28 = vpop.xlane.xlu1 %1464 }
 0x79e   : > { %2126 = vrcp.f32 %v1465_v28 }
 0x7a4   : > { %v2127_v29 = vpop.eup %2126 }
 0x7a5   : > { %v1477_v34 = vmul.f32 %v2127_v29, %v2119_v9 }
 0x7b5   : > { %v2090_v30 = vpop.permute.xlu1 %2089 }
 0x7b6   : > { %v2092_v31 = vunpack.i.h.bf16 %v2090_v30  ;;  %v2091_v32 = vunpack.i.l.bf16 %v2090_v30 }
 0x7b8   : > { %1527 = vmatpush.msrb.mxu2 %v2091_v32  ;;  %1553 = vmatpush.msra.mxu3 %v2092_v31 }
 0x7b9   : > { %2001 = vmatmul.msk.f32.vlgmr.msrb.gmra.mxu2 %vm1057_vm8, %v1477_v34 }
 0x7bd   : > { %v1314_v50 = vpop.permute.xlu1 %1313 }
 0x7d9   : > { %v1468_v33 = vpop.xlane.xlu0 %1467 }
 0x7da   : > { %2128 = vrcp.f32 %v1468_v33 }
 0x7dd   : > { %v1471_v36 = vpop.xlane.xlu2 %1470 }
 0x7de   : > { %2130 = vrcp.f32 %v1471_v36 }
 0x7e0   : > { %v2129_v35 = vpop.eup %2128 }
 0x7e1   : > { %v1478_v37 = vmul.f32 %v2129_v35, %v2121_v20 }
 0x7e3   : > { %2002 = vmatmul.msk.f32.vlgmr.msra.gmra.mxu3 %vm1057_vm8, %v1478_v37 }
 0x7e4   : > { %v2131_v5 = vpop.eup %2130 }
 0x7e5   : > { %v1479_v38 = vmul.f32 %v2131_v5, %v2123_v23 }
 0x7ec   : > { %v1559_v39 = vpop.permute.xlu0 %1558 }
 0x7ed   : > { %1579 = vmatpush.msra.mxu0 %v1559_v39 }
 0x7ee   : > { %2003 = vmatmul.msk.f32.vlgmr.msra.gmra.mxu0 %vm1057_vm8, %v1479_v38  ;;  %v1462_v40 = vpop.xlane.xlu2 %1461 }
 0x7ef   : > { %2132 = vrcp.f32 %v1462_v40 }
 0x7f4   : > { %v1310_v41 = vpop.permute.xlu0 %1309 }
 0x7f5   : > { %v2133_v42 = vpop.eup %2132  ;;  %v1320_v47 = vsel %vm1057_vm8, %v2416_v59, %v1310_v41 }
 0x7f6   : > { %v1476_v43 = vmul.f32 %v2133_v42, %v2125_v26  ;;  %v1481_v44 = vpop.permute.xlu2 %1480  ;;  %v1322_v51 = vsel %vm1321_vm13, %v1320_v47, %v1314_v50 }
 0x7f7   : > { %1501 = vmatpush.msra.mxu1 %v1481_v44 }
 0x7f8   : > { %2000 = vmatmul.msk.f32.vlgmr.msra.gmra.mxu1 %vm1057_vm8, %v1476_v43 }
 0x7f9   : > { %1620 = vmatpush.msrb.mxu1 %v485_v45 }
 0x7fb   : > { %1621 = vmatpush.msrb.mxu1 %v484_v14 }
 0x7fc   : > { %v1318_v48 = vpop.permute.xlu0 %1317 }
 0x7fd   : > { %1622 = vmatpush.msrb.mxu1 %v483_v46  ;;  %v1324_v52 = vsel %vm1323_vm14, %v1322_v51, %v1318_v48 }
 0x7ff   : > { %1623 = vmatpush.msrb.mxu1 %v482_v49 }
 0x800   : > { %2004 = vmatmul.msk.f32.vlgmr.msrb.gmra.mxu1 %vm978_vm2, %v1324_v52 }
 0x83c   : > { %v1529_v53 = vpop.f32.mrf.mxu2 }
 0x83d   : > { %1585 = vrot.lane.b32.xlu1 %v1529_v53, %s2148_s23 }
 0x866   : > { %v1555_v54 = vpop.f32.mrf.mxu3 }
 0x867   : > { %1589 = vrot.lane.b32.xlu2 %v1555_v54, %s2147_s20 }
 0x86b   : > { %v1581_v55 = vpop.f32.mrf.mxu0 }
 0x86c   : > { %1593 = vrot.lane.b32.xlu0 %v1581_v55, %s2149_s24 }
 0x875   : > { %v1503_v56 = vpop.f32.mrf.mxu1 }
 0x87d   : > { %v1625_v58 = vpop.f32.mrf.mxu1 }
 0x87e   : > { %v1626_v59 = vadd.f32 %v2093_v57, %v1625_v58 }
 0x880   : > { %1631 = vst [vmem:[%s342_s11] sm:$0xff] %v1626_v59 }
 0x8af   : > { %v1586_v60 = vpop.permute.xlu1 %1585 }
 0x8b0   : > { %v1596_v62 = vsel %vm1057_vm8, %v1503_v56, %v1586_v60 }
 0x8c1   : > { %v1590_v61 = vpop.permute.xlu2 %1589 }
 0x8c2   : > { %v1597_v63 = vsel %vm1321_vm13, %v1596_v62, %v1590_v61 }
 0x8de   : > { %v1594_v0 = vpop.permute.xlu0 %1593 }
 0x8df   : > { %v1598_v1 = vsel %vm1323_vm14, %v1597_v63, %v1594_v0 }
 0x8e0   : > { %2005 = vmatmul.msk.f32.gmra.mxu1 %vm978_vm2, %v1598_v1 }
 0x95d   : > { %v1628_v2 = vpop.f32.mrf.mxu1 }
 0x95e   : > { %v1629_v3 = vadd.f32 %v2093_v57, %v1628_v2 }
 0x960   : > { %1632 = vst [vmem:[%s342_s11 + $0x8] sm:$0xff] %v1629_v3 }
 0x961 PF: > { %s16_s21 = sadd.s32 1, %s2140_s21  }
 0x962   : > { %p13_p4 = scmp.ge.s32.totalorder %s16_s21, 4  }
 0x964   :  { %15 = sbr.rel (!%p13_p4) target bundleno = 1 (0x1), region = 89 }

</bundles_post_ra>
